<compile_context>
chip_gen: v5e
topology: v5e:2x2
jax: 0.10.0
libtpu: 0.0.40
codegen_flags: <defaults>
</compile_context>

<pallas_src>
import jax
import jax.numpy as jnp
from jax.experimental import pallas as pl
from jax.experimental.pallas import tpu as pltpu

SOIL_KERNEL_2 = 8          # soil_encode output dim = soil_kernel_2 + 1 = 9
WEEKS = 26
WEEK_WINDOWS = ((0, 13), (13, 18), (18, 22), (22, 26))   # W_CNN-path week windows


def _round8(n):
    return ((n + 7) // 8) * 8


# -----------------------------------------------------------------------------
# Parameter packing: one f32 (rows, 4H) VMEM slab + one f32 (T+3,) SMEM vector.
# Gate column layout for every 4H-wide block: [pre_r | pre_z | gi_n | gh_n].
# -----------------------------------------------------------------------------
def _build_slab(params, n_layers, H):
    G = 4 * H
    pieces, offsets, row = [], {}, [0]

    def add(name, mat):
        r, c = mat.shape
        pad_r = _round8(r)
        blk = jnp.zeros((pad_r, G), jnp.float32).at[:r, :c].set(mat.astype(jnp.float32))
        pieces.append(blk)
        offsets[name] = row[0]
        row[0] += pad_r

    # weather window-averaging matrix (one MXU dot instead of 4 sublane reduces)
    T = len(WEEK_WINDOWS)
    avg = jnp.zeros((T, WEEKS), jnp.float32)
    for t, (a, b) in enumerate(WEEK_WINDOWS):
        avg = avg.at[t, a:b].set(1.0 / (b - a))
    add("w_avg", avg)                                                        # (T, 26)

    # soil_encode (synthetic linear encoder): tanh(soil[:, :11] @ W_se + b_se)
    add("w_se", params["W_se"])                                              # (11, 9)
    add("b_se", params["b_se"])                                              # (1, 9)

    # fused soil head: [fc | fc_soil_final] weight + bias row
    add("w_soil", jnp.concatenate([params["W_fc"], params["W_sf"]], axis=1))  # (9, H+1)
    add("b_soil", jnp.concatenate([params["b_fc"], params["b_sf"]], axis=1))  # (1, H+1)

    # fc2 weight as a lane row (fc2 is evaluated on VPU/XLU, not MXU)
    add("w_fc2", params["W_fc2"].T)                                          # (1, H)

    # weather_encode (synthetic): tanh(wt @ W_we + b_we)
    add("w_we", params["W_we"])                                              # (C, F)
    add("b_we", params["b_we"].reshape(1, -1))                               # (1, F)

    # GRU layer 0: input (weather) projection w/ layer-0 bias folded in, hidden
    # weights in 4-gate layout, scalar-input row.
    W_ih_w, W_ih_s, W_hh0, b_ih0, b_hh0 = params["gru"][0]
    F = W_ih_w.shape[0]
    add("w_l0", jnp.zeros((F, G), jnp.float32).at[:, :3 * H].set(W_ih_w))    # (F, 4H)
    bias0 = jnp.concatenate([b_ih0[:, :2 * H] + b_hh0[:, :2 * H],
                             b_ih0[:, 2 * H:], b_hh0[:, 2 * H:]], axis=1)
    add("bias0", bias0)                                                      # (1, 4H)
    W0 = (jnp.zeros((H, G), jnp.float32)
          .at[:, :2 * H].set(W_hh0[:, :2 * H])          # r, z hidden parts
          .at[:, 3 * H:].set(W_hh0[:, 2 * H:]))         # gh_n hidden part
    add("w_rec_0", W0)                                                       # (H, 4H)
    add("s_in_0", jnp.zeros((1, G), jnp.float32).at[:, :3 * H].set(W_ih_s))  # (1, 4H)

    # GRU layers 1..n_layers-1: fused [x | h] weight + combined bias row
    for L in range(1, n_layers):
        W_ih, W_hh, b_ih, b_hh = params["gru"][L]
        WL = (jnp.zeros((2 * H, G), jnp.float32)
              .at[:H, :3 * H].set(W_ih)                 # input part: r, z, gi_n
              .at[H:, :2 * H].set(W_hh[:, :2 * H])      # hidden part: r, z
              .at[H:, 3 * H:].set(W_hh[:, 2 * H:]))     # hidden part: gh_n
        add(f"w_rec_{L}", WL)
        bL = jnp.concatenate([b_ih[:, :2 * H] + b_hh[:, :2 * H],
                              b_ih[:, 2 * H:], b_hh[:, 2 * H:]], axis=1)
        add(f"bias_{L}", bL)

    return jnp.concatenate(pieces, axis=0), offsets


# -----------------------------------------------------------------------------
# Pallas kernel: encoders + layer-0 projection (prologue) + GRU recurrence + heads
# -----------------------------------------------------------------------------
def _make_kernel(T, n_layers, H, B, C, F, offs):
    G = 4 * H
    S = SOIL_KERNEL_2 + 1

    def kernel(soil_ref, weather_ref, slab_ref, sc_ref, out_ref):
        # ---- hoisted parameter views (read once, above the unrolled time loop) ----
        def blk(name, rows, cols):
            o = offs[name]
            return slab_ref[o:o + rows, :cols]

        w_avg  = blk("w_avg", T, WEEKS)                                      # (T, 26)
        w_se   = blk("w_se", 11, S)                                          # (11, 9)
        b_se   = blk("b_se", 1, S)                                           # (1, 9)
        w_soil = blk("w_soil", S, H + 1)                                     # (9, H+1)
        b_soil = blk("b_soil", 1, H + 1)                                     # (1, H+1)
        w_fc2  = blk("w_fc2", 1, H)                                          # (1, H)
        w_we   = blk("w_we", C, F)                                           # (C, F)
        b_we   = blk("b_we", 1, F)                                           # (1, F)
        w_l0   = blk("w_l0", F, G)                                           # (F, 4H)
        bias0  = blk("bias0", 1, G)                                          # (1, 4H)
        W0     = blk("w_rec_0", H, G)                                        # (H, 4H)
        s0     = blk("s_in_0", 1, G)                                         # (1, 4H)
        Ws = [blk(f"w_rec_{L}", 2 * H, G) for L in range(1, n_layers)]       # (2H, 4H)
        Bs = [jnp.broadcast_to(blk(f"bias_{L}", 1, G), (B, G))               # hoisted bcast
              for L in range(1, n_layers)]
        b_fc2 = sc_ref[T + 2]                                                # SMEM scalar

        # ---- prologue (time-invariant w.r.t. the recurrence) ----
        # soil_encode + fused soil head: soil_h0 = tanh(fc(.)), xgb = tanh(fc_soil_final(.))
        soil_enc = jnp.tanh(jnp.dot(soil_ref[...], w_se,
                                    preferred_element_type=jnp.float32) + b_se)       # (B, 9)
        soil_head = jnp.tanh(jnp.dot(soil_enc, w_soil,
                                     preferred_element_type=jnp.float32) + b_soil)    # (B, H+1)
        soil_h0 = soil_head[:, :H]                                                    # (B, H)
        xgb = soil_head[:, H:H + 1]                                                   # (B, 1)

        # weather path is batch-invariant on this flag path (irrigation branch skipped):
        # window means (averaging matmul) + linear + tanh + layer-0 input projection
        # with the layer-0 GRU bias folded in.
        wt = jnp.dot(w_avg, weather_ref[...], preferred_element_type=jnp.float32)     # (T, C)
        weather_temp = jnp.tanh(jnp.dot(wt, w_we,
                                        preferred_element_type=jnp.float32) + b_we)   # (T, F)
        wproj = jnp.dot(weather_temp, w_l0,
                        preferred_element_type=jnp.float32) + bias0                   # (T, 4H)

        def gru_cell(pre, h_prev):             # columns: [r | z | gi_n | gh_n]
            rz = jax.nn.sigmoid(pre[:, 0:2 * H])        # one EUP push for r and z
            n = jnp.tanh(pre[:, 2 * H:3 * H] + rz[:, 0:H] * pre[:, 3 * H:4 * H])
            return n + rz[:, H:2 * H] * (h_prev - n)    # == (1-z)*n + z*h_prev

        def run_rnn(wp_t, scalar_in, h):
            # layer 0: weather projection + bias precomputed (wp_t); scalar input via
            # a VPU broadcast; one MXU dot per step for the hidden path.
            pre0 = (jnp.dot(h[0], W0, preferred_element_type=jnp.float32)
                    + wp_t + scalar_in * s0)
            new_h = [gru_cell(pre0, h[0])]
            x = new_h[0]
            for L in range(1, n_layers):
                xh = jnp.concatenate([x, h[L]], axis=1)                     # (B, 2H)
                pre = jnp.dot(xh, Ws[L - 1],
                              preferred_element_type=jnp.float32) + Bs[L - 1]
                hl = gru_cell(pre, h[L])
                new_h.append(hl)
                x = hl
            return x, new_h

        def fc2(top):                           # (B,H)@(H,1) on VPU + cross-lane reduce
            return jnp.tanh(jnp.sum(top * w_fc2, axis=1, keepdims=True) + b_fc2)

        # hidden = soil_h0.expand([n_layers, B, H])
        h = [soil_h0 for _ in range(n_layers)]
        scalar_in = jnp.zeros((B, 1), jnp.float32)
        acc = xgb * sc_ref[T] + sc_ref[T + 1]            # fc_yield3 running dot-product
        for t in range(T):                      # static unroll (T is small)
            wp_t = wproj[t:t + 1, :]                                        # (1, 4H)
            top, h = run_rnn(wp_t, scalar_in, h)
            out_t = fc2(top)
            if t == T - 1:
                # original forward calls the rnn a second time with the same inputs
                top, h = run_rnn(wp_t, scalar_in, h)
                out_t = fc2(top)
            out_ref[:, t:t + 1] = out_t                  # direct lane store
            acc = acc + out_t * sc_ref[t]                # incremental fc_yield3
            if t < T - 1:
                scalar_in = out_t               # teacher_force == False
        out_ref[:, T:T + 1] = acc

    return kernel


# -----------------------------------------------------------------------------
# Wrapper: minimal plain-JAX glue + pallas_call
# -----------------------------------------------------------------------------
def lstm_model_forward(params, soil, weather1, n_layers, seq_size):
    B = soil.shape[0]
    H = params["W_fc"].shape[1]
    C = weather1.shape[1]
    F = params["W_we"].shape[1]
    T = seq_size
    G = 4 * H
    assert T == len(WEEK_WINDOWS), "weather windows hard-coded for 4 week segments"
    assert weather1.shape[2] == WEEKS
    # fc_yield3 is sized at init; T is a runtime argument (correctness note).
    assert params["W_y3"].shape[1] == T + 1, "fc_yield3 expects seq_size + 1 features"

    # Raw inputs only: soil/weather encoders + layer-0 projection run inside the
    # kernel prologue (no HBM intermediates, no extra XLA dispatches).
    soil11 = soil[:, :11].astype(jnp.float32)                               # (B, 11)
    weather_t = weather1[0].T.astype(jnp.float32)                           # (26, C)
    # TODO(synk): pandas-based irrigation_data weather adjustment skipped
    # (reference forward also skips it when irrigation_data.size <= 40).

    slab, offs = _build_slab(params, n_layers, H)                           # (rows, 4H)
    scalars = jnp.concatenate([params["W_y3"][0, :], params["b_y3"][0, :],
                               params["b_fc2"][0, :]]).astype(jnp.float32)  # (T+3,)

    kernel = _make_kernel(T, n_layers, H, B, C, F, offs)
    vmem = pl.BlockSpec(memory_space=pltpu.MemorySpace.VMEM)
    smem = pl.BlockSpec(memory_space=pltpu.MemorySpace.SMEM)

    # advisory cost estimate so XLA schedules the surrounding glue ops sensibly
    rnn_flops = 2 * B * H * G + (n_layers - 1) * 2 * B * 2 * H * G
    flops = int((T + 1) * (rnn_flops + 2 * B * H)
                + 2 * B * 11 * (SOIL_KERNEL_2 + 1)
                + 2 * B * (SOIL_KERNEL_2 + 1) * (H + 1)
                + 2 * T * WEEKS * C + 2 * T * C * F + 2 * T * F * G)
    trans = int((T + 1) * (n_layers * 3 * B * H + B)
                + B * (SOIL_KERNEL_2 + 1) + B * (H + 1) + T * F)
    bytes_accessed = int(4 * (soil11.size + weather_t.size + slab.size
                              + scalars.size + B * (T + 1)))

    # NOTE(v7x): grid-less single-program kernel; VMEM footprint ~110 KiB, far
    # below 64/128 MiB, so no blocking / multi-buffering. For large batched
    # inference, add a leading grid axis over batch blocks with
    # dimension_semantics=("parallel",) and pad B to a multiple of 8 so sublanes
    # are fully occupied.
    out = pl.pallas_call(
        kernel,
        out_shape=jax.ShapeDtypeStruct((B, T + 1), jnp.float32),
        in_specs=[vmem, vmem, vmem, smem],
        out_specs=vmem,
        cost_estimate=pl.CostEstimate(flops=flops, transcendentals=trans,
                                      bytes_accessed=bytes_accessed),
    )(soil11, weather_t, slab, scalars)

    return out.T[:, :, None]                                                # (T+1, B, 1)


# -----------------------------------------------------------------------------
# Pure-JAX reference (mirrors the PyTorch forward) for a correctness check
# -----------------------------------------------------------------------------
def reference_forward(params, soil, weather1, n_layers, seq_size):
    B = soil.shape[0]
    H = params["W_fc"].shape[1]
    T = seq_size

    soil_enc = jnp.tanh(soil[:, :11] @ params["W_se"] + params["b_se"])
    w_rep = jnp.tile(weather1, (B, 1, 1))
    segs = [w_rep[:, :, a:b].mean(axis=2) for (a, b) in WEEK_WINDOWS]
    wt = jnp.stack(segs, axis=0)
    weather_temp = jnp.tanh(jnp.einsum("tbc,cf->tbf", wt, params["W_we"])
                            + params["b_we"])

    def gru_gates(gi, gh, h_prev):
        r = jax.nn.sigmoid(gi[:, :H] + gh[:, :H])
        z = jax.nn.sigmoid(gi[:, H:2 * H] + gh[:, H:2 * H])
        n = jnp.tanh(gi[:, 2 * H:] + r * gh[:, 2 * H:])
        return (1.0 - z) * n + z * h_prev

    def run_rnn(w_feat, scalar_in, h):
        W_ih_w, W_ih_s, W_hh, b_ih, b_hh = params["gru"][0]
        gi = w_feat @ W_ih_w + scalar_in @ W_ih_s + b_ih
        gh = h[0] @ W_hh + b_hh
        new_h = [gru_gates(gi, gh, h[0])]
        x = new_h[0]
        for L in range(1, n_layers):
            W_ih, W_hh2, b_ih2, b_hh2 = params["gru"][L]
            gi = x @ W_ih + b_ih2
            gh = h[L] @ W_hh2 + b_hh2
            hl = gru_gates(gi, gh, h[L])
            new_h.append(hl)
            x = hl
        return x, new_h

    soil_h0 = jnp.tanh(soil_enc @ params["W_fc"] + params["b_fc"])
    h = [soil_h0] * n_layers
    w_feat = weather_temp[0]
    scalar_in = jnp.zeros((B, 1), jnp.float32)
    outs = []
    for t in range(T):
        top, h = run_rnn(w_feat, scalar_in, h)
        out_t = jnp.tanh(top @ params["W_fc2"] + params["b_fc2"])
        if t == T - 1:
            top, h = run_rnn(w_feat, scalar_in, h)
            out_t = jnp.tanh(top @ params["W_fc2"] + params["b_fc2"])
            outs.append(out_t)
        else:
            outs.append(out_t)
            w_feat = weather_temp[t + 1]
            scalar_in = out_t
    xgb = jnp.tanh(soil_enc @ params["W_sf"] + params["b_sf"])
    feats = jnp.concatenate(outs + [xgb], axis=1)                           # (B, T+1)
    final = feats @ params["W_y3"].T + params["b_y3"]                       # (B, 1)
    return jnp.stack(outs + [final], axis=0)                                # (T+1, B, 1)


# -----------------------------------------------------------------------------
# Deterministic parameter initialization
# -----------------------------------------------------------------------------
def init_params(key, *, n_hidden, n_layers, C, F):
    H = n_hidden
    S = SOIL_KERNEL_2 + 1
    keys = list(jax.random.split(key, 16 + 8 * n_layers))
    ki = iter(keys)

    def lin(fan_in, shape):
        bound = float(fan_in) ** -0.5
        return jax.random.uniform(next(ki), shape, jnp.float32, -bound, bound)

    params = {
        "W_se": lin(11, (11, S)),  "b_se": lin(11, (1, S)),       # soil_encode (synthetic)
        "W_we": lin(C, (C, F)),    "b_we": lin(C, (1, 1, F)),     # weather_encode (synthetic)
        "W_fc": lin(S, (S, H)),    "b_fc": lin(S, (1, H)),        # fc
        "W_fc2": lin(H, (H, 1)),   "b_fc2": lin(H, (1, 1)),       # fc2
        "W_sf": lin(S, (S, 1)),    "b_sf": lin(S, (1, 1)),        # fc_soil_final
        "W_y3": lin(5, (1, 5)),    "b_y3": lin(5, (1, 1)),        # fc_yield3
    }
    gru = []
    W_ih0 = lin(H, (F + 1, 3 * H))
    gru.append((W_ih0[:F, :], W_ih0[F:, :],                       # weather part / scalar part
                lin(H, (H, 3 * H)), lin(H, (1, 3 * H)), lin(H, (1, 3 * H))))
    for _ in range(1, n_layers):
        gru.append((lin(H, (H, 3 * H)), lin(H, (H, 3 * H)),
                    lin(H, (1, 3 * H)), lin(H, (1, 3 * H))))
    params["gru"] = gru
    return params


if __name__ == "__main__":
    key = jax.random.PRNGKey(0)
    B, C, F, H, T, n_layers = 4, 6, 8, 32, 4, 2

    k_p, k_soil, k_weather = jax.random.split(key, 3)
    params = init_params(k_p, n_hidden=H, n_layers=n_layers, C=C, F=F)

    soil = jax.random.normal(k_soil, (B, 13), jnp.float32)        # 11 features + 2 plot ids
    weather1 = jax.random.normal(k_weather, (1, C, WEEKS), jnp.float32)

    # Remaining PyTorch forward args (unused on this flag path):
    irrigation_data = jnp.zeros((2, 10), jnp.float32)             # .size <= 40 -> branch skipped
    crop_plant_date = 30
    img_yield_sampling = jnp.zeros((B, T), jnp.float32)           # teacher_forcing_ratio = 0

    out = lstm_model_forward(params, soil, weather1, n_layers, T)
    out = jax.block_until_ready(out)

    ref = reference_forward(params, soil, weather1, n_layers, T)
    assert out.shape == (T + 1, B, 1)
    assert bool(jnp.all(jnp.isfinite(out)))
    assert bool(jnp.allclose(out, ref, atol=2e-3, rtol=2e-3))
    print("KERNEL_OK")
</pallas_src>

<mosaic_0001>
module attributes {stable_mosaic.version = 11 : i64} {
  func.func @kernel(%arg0: memref<4x11xf32, #tpu.memory_space<vmem>>, %arg1: memref<26x6xf32, #tpu.memory_space<vmem>>, %arg2: memref<208x128xf32, #tpu.memory_space<vmem>>, %arg3: memref<7xf32, #tpu.memory_space<smem>>, %arg4: memref<4x5xf32, #tpu.memory_space<vmem>>) attributes {dimension_semantics = [], scalar_prefetch = 0 : i64, scratch_operands = 0 : i64, tpu.core_type = #tpu.core_type<tc>} {
    %c0 = arith.constant 0 : index
    %c0_0 = arith.constant 0 : index
    %0 = vector.load %arg2[%c0, %c0_0] : memref<208x128xf32, #tpu.memory_space<vmem>>, vector<4x26xf32>
    %c8 = arith.constant 8 : index
    %c0_1 = arith.constant 0 : index
    %1 = vector.load %arg2[%c8, %c0_1] : memref<208x128xf32, #tpu.memory_space<vmem>>, vector<11x9xf32>
    %c24 = arith.constant 24 : index
    %c0_2 = arith.constant 0 : index
    %2 = vector.load %arg2[%c24, %c0_2] : memref<208x128xf32, #tpu.memory_space<vmem>>, vector<1x9xf32>
    %c32 = arith.constant 32 : index
    %c0_3 = arith.constant 0 : index
    %3 = vector.load %arg2[%c32, %c0_3] : memref<208x128xf32, #tpu.memory_space<vmem>>, vector<9x33xf32>
    %c48 = arith.constant 48 : index
    %c0_4 = arith.constant 0 : index
    %4 = vector.load %arg2[%c48, %c0_4] : memref<208x128xf32, #tpu.memory_space<vmem>>, vector<1x33xf32>
    %c56 = arith.constant 56 : index
    %c0_5 = arith.constant 0 : index
    %5 = vector.load %arg2[%c56, %c0_5] : memref<208x128xf32, #tpu.memory_space<vmem>>, vector<1x32xf32>
    %c64 = arith.constant 64 : index
    %c0_6 = arith.constant 0 : index
    %6 = vector.load %arg2[%c64, %c0_6] : memref<208x128xf32, #tpu.memory_space<vmem>>, vector<6x8xf32>
    %c72 = arith.constant 72 : index
    %c0_7 = arith.constant 0 : index
    %7 = vector.load %arg2[%c72, %c0_7] : memref<208x128xf32, #tpu.memory_space<vmem>>, vector<1x8xf32>
    %c80 = arith.constant 80 : index
    %c0_8 = arith.constant 0 : index
    %8 = vector.load %arg2[%c80, %c0_8] : memref<208x128xf32, #tpu.memory_space<vmem>>, vector<8x128xf32>
    %c88 = arith.constant 88 : index
    %c0_9 = arith.constant 0 : index
    %9 = vector.load %arg2[%c88, %c0_9] : memref<208x128xf32, #tpu.memory_space<vmem>>, vector<1x128xf32>
    %c96 = arith.constant 96 : index
    %c0_10 = arith.constant 0 : index
    %10 = vector.load %arg2[%c96, %c0_10] : memref<208x128xf32, #tpu.memory_space<vmem>>, vector<32x128xf32>
    %c128 = arith.constant 128 : index
    %c0_11 = arith.constant 0 : index
    %11 = vector.load %arg2[%c128, %c0_11] : memref<208x128xf32, #tpu.memory_space<vmem>>, vector<1x128xf32>
    %c136 = arith.constant 136 : index
    %c0_12 = arith.constant 0 : index
    %12 = vector.load %arg2[%c136, %c0_12] : memref<208x128xf32, #tpu.memory_space<vmem>>, vector<64x128xf32>
    %c200 = arith.constant 200 : index
    %c0_13 = arith.constant 0 : index
    %13 = vector.load %arg2[%c200, %c0_13] : memref<208x128xf32, #tpu.memory_space<vmem>>, vector<1x128xf32>
    %14 = vector.shape_cast %13 : vector<1x128xf32> to vector<1x128xf32>
    %15 = vector.broadcast %14 : vector<1x128xf32> to vector<4x128xf32>
    %c6 = arith.constant 6 : index
    %16 = memref.load %arg3[%c6] : memref<7xf32, #tpu.memory_space<smem>>
    %c0_14 = arith.constant 0 : index
    %c0_15 = arith.constant 0 : index
    %17 = vector.load %arg0[%c0_14, %c0_15] : memref<4x11xf32, #tpu.memory_space<vmem>>, vector<4x11xf32>
    %cst = arith.constant dense<0.000000e+00> : vector<4x9xf32>
    %18 = tpu.matmul %17, %1, %cst {dimension_numbers = #tpu.dot_dimension_numbers<[1], [0], [0], [1], [0, 0, 1, 1], [], []>} : vector<4x11xf32>, vector<11x9xf32>, vector<4x9xf32> -> vector<4x9xf32>
    %19 = vector.broadcast %2 : vector<1x9xf32> to vector<4x9xf32>
    %20 = arith.addf %18, %19 : vector<4x9xf32>
    %21 = math.tanh %20 : vector<4x9xf32>
    %cst_16 = arith.constant dense<0.000000e+00> : vector<4x33xf32>
    %22 = tpu.matmul %21, %3, %cst_16 {dimension_numbers = #tpu.dot_dimension_numbers<[1], [0], [0], [1], [0, 0, 1, 1], [], []>} : vector<4x9xf32>, vector<9x33xf32>, vector<4x33xf32> -> vector<4x33xf32>
    %23 = vector.broadcast %4 : vector<1x33xf32> to vector<4x33xf32>
    %24 = arith.addf %22, %23 : vector<4x33xf32>
    %25 = math.tanh %24 : vector<4x33xf32>
    %26 = vector.extract_strided_slice %25 {offsets = [0, 0], sizes = [4, 32], strides = [1, 1]} : vector<4x33xf32> to vector<4x32xf32>
    %27 = vector.extract_strided_slice %25 {offsets = [0, 32], sizes = [4, 1], strides = [1, 1]} : vector<4x33xf32> to vector<4x1xf32>
    %c0_17 = arith.constant 0 : index
    %c0_18 = arith.constant 0 : index
    %28 = vector.load %arg1[%c0_17, %c0_18] : memref<26x6xf32, #tpu.memory_space<vmem>>, vector<26x6xf32>
    %cst_19 = arith.constant dense<0.000000e+00> : vector<4x6xf32>
    %29 = tpu.matmul %0, %28, %cst_19 {dimension_numbers = #tpu.dot_dimension_numbers<[1], [0], [0], [1], [0, 0, 1, 1], [], []>} : vector<4x26xf32>, vector<26x6xf32>, vector<4x6xf32> -> vector<4x6xf32>
    %cst_20 = arith.constant dense<0.000000e+00> : vector<4x8xf32>
    %30 = tpu.matmul %29, %6, %cst_20 {dimension_numbers = #tpu.dot_dimension_numbers<[1], [0], [0], [1], [0, 0, 1, 1], [], []>} : vector<4x6xf32>, vector<6x8xf32>, vector<4x8xf32> -> vector<4x8xf32>
    %31 = vector.broadcast %7 : vector<1x8xf32> to vector<4x8xf32>
    %32 = arith.addf %30, %31 : vector<4x8xf32>
    %33 = math.tanh %32 : vector<4x8xf32>
    %cst_21 = arith.constant dense<0.000000e+00> : vector<4x128xf32>
    %34 = tpu.matmul %33, %8, %cst_21 {dimension_numbers = #tpu.dot_dimension_numbers<[1], [0], [0], [1], [0, 0, 1, 1], [], []>} : vector<4x8xf32>, vector<8x128xf32>, vector<4x128xf32> -> vector<4x128xf32>
    %35 = vector.broadcast %9 : vector<1x128xf32> to vector<4x128xf32>
    %36 = arith.addf %34, %35 : vector<4x128xf32>
    %cst_22 = arith.constant 0.000000e+00 : f32
    %37 = vector.broadcast %cst_22 : f32 to vector<4x1xf32>
    %c4 = arith.constant 4 : index
    %38 = memref.load %arg3[%c4] : memref<7xf32, #tpu.memory_space<smem>>
    %39 = vector.broadcast %38 : f32 to vector<4x1xf32>
    %40 = arith.mulf %27, %39 : vector<4x1xf32>
    %c5 = arith.constant 5 : index
    %41 = memref.load %arg3[%c5] : memref<7xf32, #tpu.memory_space<smem>>
    %42 = vector.broadcast %41 : f32 to vector<4x1xf32>
    %43 = arith.addf %40, %42 : vector<4x1xf32>
    %44 = vector.extract_strided_slice %36 {offsets = [0, 0], sizes = [1, 128], strides = [1, 1]} : vector<4x128xf32> to vector<1x128xf32>
    %cst_23 = arith.constant dense<0.000000e+00> : vector<4x128xf32>
    %45 = tpu.matmul %26, %10, %cst_23 {dimension_numbers = #tpu.dot_dimension_numbers<[1], [0], [0], [1], [0, 0, 1, 1], [], []>} : vector<4x32xf32>, vector<32x128xf32>, vector<4x128xf32> -> vector<4x128xf32>
    %46 = vector.broadcast %44 : vector<1x128xf32> to vector<4x128xf32>
    %47 = arith.addf %45, %46 : vector<4x128xf32>
    %48 = vector.broadcast %37 : vector<4x1xf32> to vector<4x128xf32>
    %49 = vector.broadcast %11 : vector<1x128xf32> to vector<4x128xf32>
    %50 = arith.mulf %48, %49 : vector<4x128xf32>
    %51 = arith.addf %47, %50 : vector<4x128xf32>
    %52 = vector.extract_strided_slice %51 {offsets = [0, 0], sizes = [4, 64], strides = [1, 1]} : vector<4x128xf32> to vector<4x64xf32>
    %53 = arith.negf %52 : vector<4x64xf32>
    %54 = math.exp %53 : vector<4x64xf32>
    %cst_24 = arith.constant 1.000000e+00 : f32
    %55 = vector.broadcast %cst_24 : f32 to vector<4x64xf32>
    %56 = arith.addf %55, %54 : vector<4x64xf32>
    %57 = arith.divf %55, %56 : vector<4x64xf32>
    %58 = vector.extract_strided_slice %51 {offsets = [0, 64], sizes = [4, 32], strides = [1, 1]} : vector<4x128xf32> to vector<4x32xf32>
    %59 = vector.extract_strided_slice %57 {offsets = [0, 0], sizes = [4, 32], strides = [1, 1]} : vector<4x64xf32> to vector<4x32xf32>
    %60 = vector.extract_strided_slice %51 {offsets = [0, 96], sizes = [4, 32], strides = [1, 1]} : vector<4x128xf32> to vector<4x32xf32>
    %61 = arith.mulf %59, %60 : vector<4x32xf32>
    %62 = arith.addf %58, %61 : vector<4x32xf32>
    %63 = math.tanh %62 : vector<4x32xf32>
    %64 = vector.extract_strided_slice %57 {offsets = [0, 32], sizes = [4, 32], strides = [1, 1]} : vector<4x64xf32> to vector<4x32xf32>
    %65 = arith.subf %26, %63 : vector<4x32xf32>
    %66 = arith.mulf %64, %65 : vector<4x32xf32>
    %67 = arith.addf %63, %66 : vector<4x32xf32>
    %68 = tpu.concatenate %67, %26 in 1 : vector<4x32xf32>, vector<4x32xf32> -> vector<4x64xf32>
    %cst_25 = arith.constant dense<0.000000e+00> : vector<4x128xf32>
    %69 = tpu.matmul %68, %12, %cst_25 {dimension_numbers = #tpu.dot_dimension_numbers<[1], [0], [0], [1], [0, 0, 1, 1], [], []>} : vector<4x64xf32>, vector<64x128xf32>, vector<4x128xf32> -> vector<4x128xf32>
    %70 = arith.addf %69, %15 : vector<4x128xf32>
    %71 = vector.extract_strided_slice %70 {offsets = [0, 0], sizes = [4, 64], strides = [1, 1]} : vector<4x128xf32> to vector<4x64xf32>
    %72 = arith.negf %71 : vector<4x64xf32>
    %73 = math.exp %72 : vector<4x64xf32>
    %cst_26 = arith.constant 1.000000e+00 : f32
    %74 = vector.broadcast %cst_26 : f32 to vector<4x64xf32>
    %75 = arith.addf %74, %73 : vector<4x64xf32>
    %76 = arith.divf %74, %75 : vector<4x64xf32>
    %77 = vector.extract_strided_slice %70 {offsets = [0, 64], sizes = [4, 32], strides = [1, 1]} : vector<4x128xf32> to vector<4x32xf32>
    %78 = vector.extract_strided_slice %76 {offsets = [0, 0], sizes = [4, 32], strides = [1, 1]} : vector<4x64xf32> to vector<4x32xf32>
    %79 = vector.extract_strided_slice %70 {offsets = [0, 96], sizes = [4, 32], strides = [1, 1]} : vector<4x128xf32> to vector<4x32xf32>
    %80 = arith.mulf %78, %79 : vector<4x32xf32>
    %81 = arith.addf %77, %80 : vector<4x32xf32>
    %82 = math.tanh %81 : vector<4x32xf32>
    %83 = vector.extract_strided_slice %76 {offsets = [0, 32], sizes = [4, 32], strides = [1, 1]} : vector<4x64xf32> to vector<4x32xf32>
    %84 = arith.subf %26, %82 : vector<4x32xf32>
    %85 = arith.mulf %83, %84 : vector<4x32xf32>
    %86 = arith.addf %82, %85 : vector<4x32xf32>
    %87 = vector.broadcast %5 : vector<1x32xf32> to vector<4x32xf32>
    %88 = arith.mulf %86, %87 : vector<4x32xf32>
    %cst_27 = arith.constant dense<0.000000e+00> : vector<4xf32>
    %89 = vector.multi_reduction <add>, %88, %cst_27 [1] : vector<4x32xf32> to vector<4xf32>
    %90 = vector.shape_cast %89 : vector<4xf32> to vector<4x1xf32>
    %91 = vector.broadcast %16 : f32 to vector<4x1xf32>
    %92 = arith.addf %90, %91 : vector<4x1xf32>
    %93 = math.tanh %92 : vector<4x1xf32>
    %c0_28 = arith.constant 0 : index
    %c0_29 = arith.constant 0 : index
    %94 = vector.load %arg4[%c0_28, %c0_29] : memref<4x5xf32, #tpu.memory_space<vmem>>, vector<4x1xf32>
    tpu.vector_store %arg4[%c0_28, %c0_29], %93 {strides = array<i32>} : memref<4x5xf32, #tpu.memory_space<vmem>>, vector<4x1xf32>,
    %c0_30 = arith.constant 0 : index
    %95 = memref.load %arg3[%c0_30] : memref<7xf32, #tpu.memory_space<smem>>
    %96 = vector.broadcast %95 : f32 to vector<4x1xf32>
    %97 = arith.mulf %93, %96 : vector<4x1xf32>
    %98 = arith.addf %43, %97 : vector<4x1xf32>
    %99 = vector.extract_strided_slice %36 {offsets = [1, 0], sizes = [1, 128], strides = [1, 1]} : vector<4x128xf32> to vector<1x128xf32>
    %cst_31 = arith.constant dense<0.000000e+00> : vector<4x128xf32>
    %100 = tpu.matmul %67, %10, %cst_31 {dimension_numbers = #tpu.dot_dimension_numbers<[1], [0], [0], [1], [0, 0, 1, 1], [], []>} : vector<4x32xf32>, vector<32x128xf32>, vector<4x128xf32> -> vector<4x128xf32>
    %101 = vector.broadcast %99 : vector<1x128xf32> to vector<4x128xf32>
    %102 = arith.addf %100, %101 : vector<4x128xf32>
    %103 = vector.broadcast %93 : vector<4x1xf32> to vector<4x128xf32>
    %104 = vector.broadcast %11 : vector<1x128xf32> to vector<4x128xf32>
    %105 = arith.mulf %103, %104 : vector<4x128xf32>
    %106 = arith.addf %102, %105 : vector<4x128xf32>
    %107 = vector.extract_strided_slice %106 {offsets = [0, 0], sizes = [4, 64], strides = [1, 1]} : vector<4x128xf32> to vector<4x64xf32>
    %108 = arith.negf %107 : vector<4x64xf32>
    %109 = math.exp %108 : vector<4x64xf32>
    %cst_32 = arith.constant 1.000000e+00 : f32
    %110 = vector.broadcast %cst_32 : f32 to vector<4x64xf32>
    %111 = arith.addf %110, %109 : vector<4x64xf32>
    %112 = arith.divf %110, %111 : vector<4x64xf32>
    %113 = vector.extract_strided_slice %106 {offsets = [0, 64], sizes = [4, 32], strides = [1, 1]} : vector<4x128xf32> to vector<4x32xf32>
    %114 = vector.extract_strided_slice %112 {offsets = [0, 0], sizes = [4, 32], strides = [1, 1]} : vector<4x64xf32> to vector<4x32xf32>
    %115 = vector.extract_strided_slice %106 {offsets = [0, 96], sizes = [4, 32], strides = [1, 1]} : vector<4x128xf32> to vector<4x32xf32>
    %116 = arith.mulf %114, %115 : vector<4x32xf32>
    %117 = arith.addf %113, %116 : vector<4x32xf32>
    %118 = math.tanh %117 : vector<4x32xf32>
    %119 = vector.extract_strided_slice %112 {offsets = [0, 32], sizes = [4, 32], strides = [1, 1]} : vector<4x64xf32> to vector<4x32xf32>
    %120 = arith.subf %67, %118 : vector<4x32xf32>
    %121 = arith.mulf %119, %120 : vector<4x32xf32>
    %122 = arith.addf %118, %121 : vector<4x32xf32>
    %123 = tpu.concatenate %122, %86 in 1 : vector<4x32xf32>, vector<4x32xf32> -> vector<4x64xf32>
    %cst_33 = arith.constant dense<0.000000e+00> : vector<4x128xf32>
    %124 = tpu.matmul %123, %12, %cst_33 {dimension_numbers = #tpu.dot_dimension_numbers<[1], [0], [0], [1], [0, 0, 1, 1], [], []>} : vector<4x64xf32>, vector<64x128xf32>, vector<4x128xf32> -> vector<4x128xf32>
    %125 = arith.addf %124, %15 : vector<4x128xf32>
    %126 = vector.extract_strided_slice %125 {offsets = [0, 0], sizes = [4, 64], strides = [1, 1]} : vector<4x128xf32> to vector<4x64xf32>
    %127 = arith.negf %126 : vector<4x64xf32>
    %128 = math.exp %127 : vector<4x64xf32>
    %cst_34 = arith.constant 1.000000e+00 : f32
    %129 = vector.broadcast %cst_34 : f32 to vector<4x64xf32>
    %130 = arith.addf %129, %128 : vector<4x64xf32>
    %131 = arith.divf %129, %130 : vector<4x64xf32>
    %132 = vector.extract_strided_slice %125 {offsets = [0, 64], sizes = [4, 32], strides = [1, 1]} : vector<4x128xf32> to vector<4x32xf32>
    %133 = vector.extract_strided_slice %131 {offsets = [0, 0], sizes = [4, 32], strides = [1, 1]} : vector<4x64xf32> to vector<4x32xf32>
    %134 = vector.extract_strided_slice %125 {offsets = [0, 96], sizes = [4, 32], strides = [1, 1]} : vector<4x128xf32> to vector<4x32xf32>
    %135 = arith.mulf %133, %134 : vector<4x32xf32>
    %136 = arith.addf %132, %135 : vector<4x32xf32>
    %137 = math.tanh %136 : vector<4x32xf32>
    %138 = vector.extract_strided_slice %131 {offsets = [0, 32], sizes = [4, 32], strides = [1, 1]} : vector<4x64xf32> to vector<4x32xf32>
    %139 = arith.subf %86, %137 : vector<4x32xf32>
    %140 = arith.mulf %138, %139 : vector<4x32xf32>
    %141 = arith.addf %137, %140 : vector<4x32xf32>
    %142 = vector.broadcast %5 : vector<1x32xf32> to vector<4x32xf32>
    %143 = arith.mulf %141, %142 : vector<4x32xf32>
    %cst_35 = arith.constant dense<0.000000e+00> : vector<4xf32>
    %144 = vector.multi_reduction <add>, %143, %cst_35 [1] : vector<4x32xf32> to vector<4xf32>
    %145 = vector.shape_cast %144 : vector<4xf32> to vector<4x1xf32>
    %146 = vector.broadcast %16 : f32 to vector<4x1xf32>
    %147 = arith.addf %145, %146 : vector<4x1xf32>
    %148 = math.tanh %147 : vector<4x1xf32>
    %c0_36 = arith.constant 0 : index
    %c1 = arith.constant 1 : index
    %149 = vector.load %arg4[%c0_36, %c1] : memref<4x5xf32, #tpu.memory_space<vmem>>, vector<4x1xf32>
    tpu.vector_store %arg4[%c0_36, %c1], %148 {strides = array<i32>} : memref<4x5xf32, #tpu.memory_space<vmem>>, vector<4x1xf32>,
    %c1_37 = arith.constant 1 : index
    %150 = memref.load %arg3[%c1_37] : memref<7xf32, #tpu.memory_space<smem>>
    %151 = vector.broadcast %150 : f32 to vector<4x1xf32>
    %152 = arith.mulf %148, %151 : vector<4x1xf32>
    %153 = arith.addf %98, %152 : vector<4x1xf32>
    %154 = vector.extract_strided_slice %36 {offsets = [2, 0], sizes = [1, 128], strides = [1, 1]} : vector<4x128xf32> to vector<1x128xf32>
    %cst_38 = arith.constant dense<0.000000e+00> : vector<4x128xf32>
    %155 = tpu.matmul %122, %10, %cst_38 {dimension_numbers = #tpu.dot_dimension_numbers<[1], [0], [0], [1], [0, 0, 1, 1], [], []>} : vector<4x32xf32>, vector<32x128xf32>, vector<4x128xf32> -> vector<4x128xf32>
    %156 = vector.broadcast %154 : vector<1x128xf32> to vector<4x128xf32>
    %157 = arith.addf %155, %156 : vector<4x128xf32>
    %158 = vector.broadcast %148 : vector<4x1xf32> to vector<4x128xf32>
    %159 = vector.broadcast %11 : vector<1x128xf32> to vector<4x128xf32>
    %160 = arith.mulf %158, %159 : vector<4x128xf32>
    %161 = arith.addf %157, %160 : vector<4x128xf32>
    %162 = vector.extract_strided_slice %161 {offsets = [0, 0], sizes = [4, 64], strides = [1, 1]} : vector<4x128xf32> to vector<4x64xf32>
    %163 = arith.negf %162 : vector<4x64xf32>
    %164 = math.exp %163 : vector<4x64xf32>
    %cst_39 = arith.constant 1.000000e+00 : f32
    %165 = vector.broadcast %cst_39 : f32 to vector<4x64xf32>
    %166 = arith.addf %165, %164 : vector<4x64xf32>
    %167 = arith.divf %165, %166 : vector<4x64xf32>
    %168 = vector.extract_strided_slice %161 {offsets = [0, 64], sizes = [4, 32], strides = [1, 1]} : vector<4x128xf32> to vector<4x32xf32>
    %169 = vector.extract_strided_slice %167 {offsets = [0, 0], sizes = [4, 32], strides = [1, 1]} : vector<4x64xf32> to vector<4x32xf32>
    %170 = vector.extract_strided_slice %161 {offsets = [0, 96], sizes = [4, 32], strides = [1, 1]} : vector<4x128xf32> to vector<4x32xf32>
    %171 = arith.mulf %169, %170 : vector<4x32xf32>
    %172 = arith.addf %168, %171 : vector<4x32xf32>
    %173 = math.tanh %172 : vector<4x32xf32>
    %174 = vector.extract_strided_slice %167 {offsets = [0, 32], sizes = [4, 32], strides = [1, 1]} : vector<4x64xf32> to vector<4x32xf32>
    %175 = arith.subf %122, %173 : vector<4x32xf32>
    %176 = arith.mulf %174, %175 : vector<4x32xf32>
    %177 = arith.addf %173, %176 : vector<4x32xf32>
    %178 = tpu.concatenate %177, %141 in 1 : vector<4x32xf32>, vector<4x32xf32> -> vector<4x64xf32>
    %cst_40 = arith.constant dense<0.000000e+00> : vector<4x128xf32>
    %179 = tpu.matmul %178, %12, %cst_40 {dimension_numbers = #tpu.dot_dimension_numbers<[1], [0], [0], [1], [0, 0, 1, 1], [], []>} : vector<4x64xf32>, vector<64x128xf32>, vector<4x128xf32> -> vector<4x128xf32>
    %180 = arith.addf %179, %15 : vector<4x128xf32>
    %181 = vector.extract_strided_slice %180 {offsets = [0, 0], sizes = [4, 64], strides = [1, 1]} : vector<4x128xf32> to vector<4x64xf32>
    %182 = arith.negf %181 : vector<4x64xf32>
    %183 = math.exp %182 : vector<4x64xf32>
    %cst_41 = arith.constant 1.000000e+00 : f32
    %184 = vector.broadcast %cst_41 : f32 to vector<4x64xf32>
    %185 = arith.addf %184, %183 : vector<4x64xf32>
    %186 = arith.divf %184, %185 : vector<4x64xf32>
    %187 = vector.extract_strided_slice %180 {offsets = [0, 64], sizes = [4, 32], strides = [1, 1]} : vector<4x128xf32> to vector<4x32xf32>
    %188 = vector.extract_strided_slice %186 {offsets = [0, 0], sizes = [4, 32], strides = [1, 1]} : vector<4x64xf32> to vector<4x32xf32>
    %189 = vector.extract_strided_slice %180 {offsets = [0, 96], sizes = [4, 32], strides = [1, 1]} : vector<4x128xf32> to vector<4x32xf32>
    %190 = arith.mulf %188, %189 : vector<4x32xf32>
    %191 = arith.addf %187, %190 : vector<4x32xf32>
    %192 = math.tanh %191 : vector<4x32xf32>
    %193 = vector.extract_strided_slice %186 {offsets = [0, 32], sizes = [4, 32], strides = [1, 1]} : vector<4x64xf32> to vector<4x32xf32>
    %194 = arith.subf %141, %192 : vector<4x32xf32>
    %195 = arith.mulf %193, %194 : vector<4x32xf32>
    %196 = arith.addf %192, %195 : vector<4x32xf32>
    %197 = vector.broadcast %5 : vector<1x32xf32> to vector<4x32xf32>
    %198 = arith.mulf %196, %197 : vector<4x32xf32>
    %cst_42 = arith.constant dense<0.000000e+00> : vector<4xf32>
    %199 = vector.multi_reduction <add>, %198, %cst_42 [1] : vector<4x32xf32> to vector<4xf32>
    %200 = vector.shape_cast %199 : vector<4xf32> to vector<4x1xf32>
    %201 = vector.broadcast %16 : f32 to vector<4x1xf32>
    %202 = arith.addf %200, %201 : vector<4x1xf32>
    %203 = math.tanh %202 : vector<4x1xf32>
    %c0_43 = arith.constant 0 : index
    %c2 = arith.constant 2 : index
    %204 = vector.load %arg4[%c0_43, %c2] : memref<4x5xf32, #tpu.memory_space<vmem>>, vector<4x1xf32>
    tpu.vector_store %arg4[%c0_43, %c2], %203 {strides = array<i32>} : memref<4x5xf32, #tpu.memory_space<vmem>>, vector<4x1xf32>,
    %c2_44 = arith.constant 2 : index
    %205 = memref.load %arg3[%c2_44] : memref<7xf32, #tpu.memory_space<smem>>
    %206 = vector.broadcast %205 : f32 to vector<4x1xf32>
    %207 = arith.mulf %203, %206 : vector<4x1xf32>
    %208 = arith.addf %153, %207 : vector<4x1xf32>
    %209 = vector.extract_strided_slice %36 {offsets = [3, 0], sizes = [1, 128], strides = [1, 1]} : vector<4x128xf32> to vector<1x128xf32>
    %cst_45 = arith.constant dense<0.000000e+00> : vector<4x128xf32>
    %210 = tpu.matmul %177, %10, %cst_45 {dimension_numbers = #tpu.dot_dimension_numbers<[1], [0], [0], [1], [0, 0, 1, 1], [], []>} : vector<4x32xf32>, vector<32x128xf32>, vector<4x128xf32> -> vector<4x128xf32>
    %211 = vector.broadcast %209 : vector<1x128xf32> to vector<4x128xf32>
    %212 = arith.addf %210, %211 : vector<4x128xf32>
    %213 = vector.broadcast %203 : vector<4x1xf32> to vector<4x128xf32>
    %214 = vector.broadcast %11 : vector<1x128xf32> to vector<4x128xf32>
    %215 = arith.mulf %213, %214 : vector<4x128xf32>
    %216 = arith.addf %212, %215 : vector<4x128xf32>
    %217 = vector.extract_strided_slice %216 {offsets = [0, 0], sizes = [4, 64], strides = [1, 1]} : vector<4x128xf32> to vector<4x64xf32>
    %218 = arith.negf %217 : vector<4x64xf32>
    %219 = math.exp %218 : vector<4x64xf32>
    %cst_46 = arith.constant 1.000000e+00 : f32
    %220 = vector.broadcast %cst_46 : f32 to vector<4x64xf32>
    %221 = arith.addf %220, %219 : vector<4x64xf32>
    %222 = arith.divf %220, %221 : vector<4x64xf32>
    %223 = vector.extract_strided_slice %216 {offsets = [0, 64], sizes = [4, 32], strides = [1, 1]} : vector<4x128xf32> to vector<4x32xf32>
    %224 = vector.extract_strided_slice %222 {offsets = [0, 0], sizes = [4, 32], strides = [1, 1]} : vector<4x64xf32> to vector<4x32xf32>
    %225 = vector.extract_strided_slice %216 {offsets = [0, 96], sizes = [4, 32], strides = [1, 1]} : vector<4x128xf32> to vector<4x32xf32>
    %226 = arith.mulf %224, %225 : vector<4x32xf32>
    %227 = arith.addf %223, %226 : vector<4x32xf32>
    %228 = math.tanh %227 : vector<4x32xf32>
    %229 = vector.extract_strided_slice %222 {offsets = [0, 32], sizes = [4, 32], strides = [1, 1]} : vector<4x64xf32> to vector<4x32xf32>
    %230 = arith.subf %177, %228 : vector<4x32xf32>
    %231 = arith.mulf %229, %230 : vector<4x32xf32>
    %232 = arith.addf %228, %231 : vector<4x32xf32>
    %233 = tpu.concatenate %232, %196 in 1 : vector<4x32xf32>, vector<4x32xf32> -> vector<4x64xf32>
    %cst_47 = arith.constant dense<0.000000e+00> : vector<4x128xf32>
    %234 = tpu.matmul %233, %12, %cst_47 {dimension_numbers = #tpu.dot_dimension_numbers<[1], [0], [0], [1], [0, 0, 1, 1], [], []>} : vector<4x64xf32>, vector<64x128xf32>, vector<4x128xf32> -> vector<4x128xf32>
    %235 = arith.addf %234, %15 : vector<4x128xf32>
    %236 = vector.extract_strided_slice %235 {offsets = [0, 0], sizes = [4, 64], strides = [1, 1]} : vector<4x128xf32> to vector<4x64xf32>
    %237 = arith.negf %236 : vector<4x64xf32>
    %238 = math.exp %237 : vector<4x64xf32>
    %cst_48 = arith.constant 1.000000e+00 : f32
    %239 = vector.broadcast %cst_48 : f32 to vector<4x64xf32>
    %240 = arith.addf %239, %238 : vector<4x64xf32>
    %241 = arith.divf %239, %240 : vector<4x64xf32>
    %242 = vector.extract_strided_slice %235 {offsets = [0, 64], sizes = [4, 32], strides = [1, 1]} : vector<4x128xf32> to vector<4x32xf32>
    %243 = vector.extract_strided_slice %241 {offsets = [0, 0], sizes = [4, 32], strides = [1, 1]} : vector<4x64xf32> to vector<4x32xf32>
    %244 = vector.extract_strided_slice %235 {offsets = [0, 96], sizes = [4, 32], strides = [1, 1]} : vector<4x128xf32> to vector<4x32xf32>
    %245 = arith.mulf %243, %244 : vector<4x32xf32>
    %246 = arith.addf %242, %245 : vector<4x32xf32>
    %247 = math.tanh %246 : vector<4x32xf32>
    %248 = vector.extract_strided_slice %241 {offsets = [0, 32], sizes = [4, 32], strides = [1, 1]} : vector<4x64xf32> to vector<4x32xf32>
    %249 = arith.subf %196, %247 : vector<4x32xf32>
    %250 = arith.mulf %248, %249 : vector<4x32xf32>
    %251 = arith.addf %247, %250 : vector<4x32xf32>
    %cst_49 = arith.constant dense<0.000000e+00> : vector<4x128xf32>
    %252 = tpu.matmul %232, %10, %cst_49 {dimension_numbers = #tpu.dot_dimension_numbers<[1], [0], [0], [1], [0, 0, 1, 1], [], []>} : vector<4x32xf32>, vector<32x128xf32>, vector<4x128xf32> -> vector<4x128xf32>
    %253 = vector.broadcast %209 : vector<1x128xf32> to vector<4x128xf32>
    %254 = arith.addf %252, %253 : vector<4x128xf32>
    %255 = vector.broadcast %203 : vector<4x1xf32> to vector<4x128xf32>
    %256 = vector.broadcast %11 : vector<1x128xf32> to vector<4x128xf32>
    %257 = arith.mulf %255, %256 : vector<4x128xf32>
    %258 = arith.addf %254, %257 : vector<4x128xf32>
    %259 = vector.extract_strided_slice %258 {offsets = [0, 0], sizes = [4, 64], strides = [1, 1]} : vector<4x128xf32> to vector<4x64xf32>
    %260 = arith.negf %259 : vector<4x64xf32>
    %261 = math.exp %260 : vector<4x64xf32>
    %cst_50 = arith.constant 1.000000e+00 : f32
    %262 = vector.broadcast %cst_50 : f32 to vector<4x64xf32>
    %263 = arith.addf %262, %261 : vector<4x64xf32>
    %264 = arith.divf %262, %263 : vector<4x64xf32>
    %265 = vector.extract_strided_slice %258 {offsets = [0, 64], sizes = [4, 32], strides = [1, 1]} : vector<4x128xf32> to vector<4x32xf32>
    %266 = vector.extract_strided_slice %264 {offsets = [0, 0], sizes = [4, 32], strides = [1, 1]} : vector<4x64xf32> to vector<4x32xf32>
    %267 = vector.extract_strided_slice %258 {offsets = [0, 96], sizes = [4, 32], strides = [1, 1]} : vector<4x128xf32> to vector<4x32xf32>
    %268 = arith.mulf %266, %267 : vector<4x32xf32>
    %269 = arith.addf %265, %268 : vector<4x32xf32>
    %270 = math.tanh %269 : vector<4x32xf32>
    %271 = vector.extract_strided_slice %264 {offsets = [0, 32], sizes = [4, 32], strides = [1, 1]} : vector<4x64xf32> to vector<4x32xf32>
    %272 = arith.subf %232, %270 : vector<4x32xf32>
    %273 = arith.mulf %271, %272 : vector<4x32xf32>
    %274 = arith.addf %270, %273 : vector<4x32xf32>
    %275 = tpu.concatenate %274, %251 in 1 : vector<4x32xf32>, vector<4x32xf32> -> vector<4x64xf32>
    %cst_51 = arith.constant dense<0.000000e+00> : vector<4x128xf32>
    %276 = tpu.matmul %275, %12, %cst_51 {dimension_numbers = #tpu.dot_dimension_numbers<[1], [0], [0], [1], [0, 0, 1, 1], [], []>} : vector<4x64xf32>, vector<64x128xf32>, vector<4x128xf32> -> vector<4x128xf32>
    %277 = arith.addf %276, %15 : vector<4x128xf32>
    %278 = vector.extract_strided_slice %277 {offsets = [0, 0], sizes = [4, 64], strides = [1, 1]} : vector<4x128xf32> to vector<4x64xf32>
    %279 = arith.negf %278 : vector<4x64xf32>
    %280 = math.exp %279 : vector<4x64xf32>
    %cst_52 = arith.constant 1.000000e+00 : f32
    %281 = vector.broadcast %cst_52 : f32 to vector<4x64xf32>
    %282 = arith.addf %281, %280 : vector<4x64xf32>
    %283 = arith.divf %281, %282 : vector<4x64xf32>
    %284 = vector.extract_strided_slice %277 {offsets = [0, 64], sizes = [4, 32], strides = [1, 1]} : vector<4x128xf32> to vector<4x32xf32>
    %285 = vector.extract_strided_slice %283 {offsets = [0, 0], sizes = [4, 32], strides = [1, 1]} : vector<4x64xf32> to vector<4x32xf32>
    %286 = vector.extract_strided_slice %277 {offsets = [0, 96], sizes = [4, 32], strides = [1, 1]} : vector<4x128xf32> to vector<4x32xf32>
    %287 = arith.mulf %285, %286 : vector<4x32xf32>
    %288 = arith.addf %284, %287 : vector<4x32xf32>
    %289 = math.tanh %288 : vector<4x32xf32>
    %290 = vector.extract_strided_slice %283 {offsets = [0, 32], sizes = [4, 32], strides = [1, 1]} : vector<4x64xf32> to vector<4x32xf32>
    %291 = arith.subf %251, %289 : vector<4x32xf32>
    %292 = arith.mulf %290, %291 : vector<4x32xf32>
    %293 = arith.addf %289, %292 : vector<4x32xf32>
    %294 = vector.broadcast %5 : vector<1x32xf32> to vector<4x32xf32>
    %295 = arith.mulf %293, %294 : vector<4x32xf32>
    %cst_53 = arith.constant dense<0.000000e+00> : vector<4xf32>
    %296 = vector.multi_reduction <add>, %295, %cst_53 [1] : vector<4x32xf32> to vector<4xf32>
    %297 = vector.shape_cast %296 : vector<4xf32> to vector<4x1xf32>
    %298 = vector.broadcast %16 : f32 to vector<4x1xf32>
    %299 = arith.addf %297, %298 : vector<4x1xf32>
    %300 = math.tanh %299 : vector<4x1xf32>
    %c0_54 = arith.constant 0 : index
    %c3 = arith.constant 3 : index
    %301 = vector.load %arg4[%c0_54, %c3] : memref<4x5xf32, #tpu.memory_space<vmem>>, vector<4x1xf32>
    tpu.vector_store %arg4[%c0_54, %c3], %300 {strides = array<i32>} : memref<4x5xf32, #tpu.memory_space<vmem>>, vector<4x1xf32>,
    %c3_55 = arith.constant 3 : index
    %302 = memref.load %arg3[%c3_55] : memref<7xf32, #tpu.memory_space<smem>>
    %303 = vector.broadcast %302 : f32 to vector<4x1xf32>
    %304 = arith.mulf %300, %303 : vector<4x1xf32>
    %305 = arith.addf %208, %304 : vector<4x1xf32>
    %c0_56 = arith.constant 0 : index
    %c4_57 = arith.constant 4 : index
    %306 = vector.load %arg4[%c0_56, %c4_57] : memref<4x5xf32, #tpu.memory_space<vmem>>, vector<4x1xf32>
    tpu.vector_store %arg4[%c0_56, %c4_57], %305 {strides = array<i32>} : memref<4x5xf32, #tpu.memory_space<vmem>>, vector<4x1xf32>,
    return
  }
}

</mosaic_0001>

<bundles_post_ra>
// kernel: tpu_custom_call.1
= control target key start
LH: loop header
LB: loop body
LE: loop exit
PB: predicated region body
PF: predicated region fallthrough
CT: control target
= control target key end

     0   :  { %9 = vsyncpa [#allocation3], 0  ;;  %s1517_s0 = inlined_call_operand.vmem [shape: f32[4,11], index: 0, kind: input, shape index: {}]   ;;  %s1518_s1 = inlined_call_operand.vmem [shape: f32[26,6], index: 1, kind: input, shape index: {}]   ;;  %s1519_s2 = inlined_call_operand.hbm [shape: f32[208,128], index: 2, kind: input, shape index: {}]   ;;  %s1520_s3 = inlined_call_operand.vmem [shape: f32[7], index: 3, kind: input, shape index: {}]   ;;  %s1521_s4 = inlined_call_operand.hbm [shape: f32[4,5], index: 4, kind: output, shape index: {}]  }
   0x1   :  { %10 = vsyncpa [#allocation5], 0 }
   0x2   :  { %11 = vsyncpa [#allocation4], 0  ;;  %s20_s17 = sshll.u32 %s1519_s2, 4  ;;  %s1219_s18 = smov [#allocation2]   ;;  %s21_s17 = int_to_ptr.hbm [resolvable:$true] %s20_s17 }
   0x3   :  { %s22_s19 = sshll.u32 %s1219_s18, 4  ;;  %s34_s22 = sshll.u32 %s1520_s3, 4  ;;  %s23_s19 = int_to_ptr.vmem [resolvable:$true] %s22_s19  ;;  %s35_s22 = int_to_ptr.vmem [resolvable:$true] %s34_s22 }
   0x4   :  { %s1220_s23 = smov 128   ;;  %s1221_s24 = smov 8  }
   0x5   :  { %28 = dma.hbm_to_vmem [thread:$0]  %s21_s17, 3328, %s23_s19, [#allocation3], %s1220_s23, %s1220_s23, %s1221_s24  }
   0x6   :  { %s1222_s25 = smov [#allocation6]  }
   0x7   :  { %37 = dma.vmem_to_smem %s35_s22, 16, %s1222_s25, [#allocation5]  }
   0x8   :  { %1213 = dma.done.wait [#allocation3], 3328  }
   0x9   :  { %1214 = vsyncadd [#allocation3], 4294963968 }
   0xa   :  { %1215 = dma.done.wait [#allocation5], 16  }
   0xb   :  { %1216 = vsyncadd [#allocation5], 4294967280 }
   0xc   :  { %46 = sfence }
   0xd   :  { %v49_v0 = vld [vmem:[#allocation2 + $0x10] sm:$0x7]  ;;  %vm81_vm0 = vcmask 1042432   ;;  %v48_v1 = vld [vmem:[#allocation2 + $0x8] sm:$0xff]  ;;  %v75_v2 = vld [vmem:[%s1517_s0] sm:$0xf] }
   0xe   :  { %1029 = vmatpush.msk.msra.mxu2 %vm81_vm0, %v49_v0  ;;  %vm77_vm1 = vcmask 89088   ;;  %v139_v3 = vld [vmem:[%s1518_s1 + $0x18] sm:$0x3]  ;;  %vm144_vm2 = vcmask 1041408   ;;  %v138_v4 = vld [vmem:[%s1518_s1 + $0x10] sm:$0xff]  ;;  %v137_v5 = vld [vmem:[%s1518_s1 + $0x8] sm:$0xff] }
   0xf   :  { %v136_v6 = vld [vmem:[%s1518_s1] sm:$0xff]  ;;  %vm140_vm3 = vcmask 211968   ;;  %v52_v8 = vld [vmem:[#allocation2 + $0x28] sm:$0x1]  ;;  %vm111_vm4 = vcmask 1040384   ;;  %vm173_vm5 = vcmask 1045504  }
  0x10   :  { %100 = vmatpush.msra.mxu2 %v48_v1  ;;  %v47_v7 = vld [vmem:[#allocation2] sm:$0xf]  ;;  %1031 = vmatpush.msk.msra.mxu1 %vm111_vm4, %v52_v8  ;;  %v1072_v11 = vld [vmem:[#allocation2 + $0x18] ss:$0 sm:$0xff]  ;;  %vm169_vm6 = vcmask 48128   ;;  %vm107_vm7 = vcmask 72704  }
  0x11   :  { %1030 = vmatmul.msk.f32.vlgmr.msra.gmra.mxu2 %vm77_vm1, %v75_v2  ;;  %v55_v9 = vld [vmem:[#allocation2 + $0x40] sm:$0x3f]  ;;  %v1274_v16 = vld [vmem:[#allocation2 + $0x78] sm:$0xff]  ;;  %v1278_v17 = vld [vmem:[#allocation2 + $0x70] sm:$0xff]  ;;  %vm230_vm8 = vcmask 261120   ;;  %vm199_vm9 = vcmask 64512  }
  0x12   :  { %1033 = vmatpush.msk.msrb.mxu2 %vm144_vm2, %v139_v3  ;;  %1035 = vmatpush.msk.msra.mxu3 %vm173_vm5, %v55_v9  ;;  %v51_v10 = vld [vmem:[#allocation2 + $0x20] sm:$0xff]  ;;  %v1282_v18 = vld [vmem:[#allocation2 + $0x68] sm:$0xff]  ;;  %v57_v19 = vld [vmem:[#allocation2 + $0x50] sm:$0xff]  ;;  %s1223_s1 = smov 32   ;;  %s1224_s7 = smov 64   ;;  %vm310_vm14 = vcmask 523264  }
  0x13   :  { %130 = vmatpush.msra.mxu1 %v51_v10  ;;  %246 = vmatpush.msra.mxu0 %v1274_v16  ;;  %v1286_v20 = vld [vmem:[#allocation2 + $0x60] sm:$0xff]  ;;  %v1073_v21 = vld [vmem:[#allocation2 + $0x30] ss:$0 sm:$0xff]  ;;  %v1074_v24 = vld [vmem:[#allocation2 + $0x48] ss:$0 sm:$0xff]  ;;  %s1028_s8 = sld [smem:[#allocation6 + $0x6]] }
  0x14   :  { %161 = vmatpush.msrb.mxu2 %v138_v4  ;;  %218 = vmatpush.msrb.mxu3 %v57_v19  ;;  %v1075_v29 = vld [vmem:[#allocation2 + $0x58] ss:$0 sm:$0xff]  ;;  %v1302_v30 = vld [vmem:[#allocation2 + $0x80] ss:$0 sm:$0xff]  ;;  %v1322_v62 = vld [vmem:[#allocation2 + $0xb0] sm:$0xff]  ;;  %vm396_vm4 = vcmask 3072  }
  0x15   :  { %247 = vmatpush.msra.mxu0 %v1278_v17  ;;  %v255_v34 = vmul.f32 0.0, %v1302_v30  ;;  %v1316_v60 = vld [vmem:[#allocation2 + $0xc0] sm:$0xff]  ;;  %v1318_v61 = vld [vmem:[#allocation2 + $0xb8] sm:$0xff]  ;;  %v1327_v63 = vld [vmem:[#allocation2 + $0xa8] sm:$0xff]  ;;  %s1225_s9 = smov 96   ;;  %s1038_s10 = sld [smem:[#allocation6 + $0x4]] }
  0x16   :  { %162 = vmatpush.msrb.mxu2 %v137_v5  ;;  %322 = vmatpush.msrb.mxu1 %v1316_v60  ;;  %v1332_v0 = vld [vmem:[#allocation2 + $0xa0] sm:$0xff]  ;;  %v1337_v1 = vld [vmem:[#allocation2 + $0x98] sm:$0xff]  ;;  %v1342_v2 = vld [vmem:[#allocation2 + $0x90] sm:$0xff]  ;;  %s398_s11 = sld [smem:[#allocation6]]  ;;  %s1226_s16 = smov 100  }
  0x17   :  { %248 = vmatpush.msra.mxu0 %v1282_v18  ;;  %v1355_v5 = vld [vmem:[#allocation2 + $0x88] sm:$0xff]  ;;  %s1039_s12 = sld [smem:[#allocation6 + $0x5]]  ;;  %s1227_s17 = smov [#allocation7]  }
  0x18   :  { %163 = vmatpush.msrb.mxu2 %v136_v6  ;;  %323 = vmatpush.msrb.mxu1 %v1318_v61  ;;  %v1375_v9 = vld [vmem:[#allocation2 + $0xc8] ss:$0 sm:$0xff]  ;;  %s1048_s13 = sld [smem:[#allocation6 + $0x1]]  ;;  %s1015_s18 = sshll.u32 %s1227_s17, 4  ;;  %s1016_s18 = int_to_ptr.vmem [resolvable:$true] %s1015_s18 }
  0x19   :  { %1034 = vmatmul.msk.f32.vlgmr.msrb.gmra.mxu2 %vm140_vm3, %v47_v7  ;;  %249 = vmatpush.msra.mxu0 %v1286_v20  ;;  %vm389_vm3 = vcmask 257024   ;;  %s1053_s14 = sld [smem:[#allocation6 + $0x2]]  ;;  %s1017_s21 = sshll.u32 %s1521_s4, 4  ;;  %s1018_s21 = int_to_ptr.hbm [resolvable:$true] %s1017_s21 }
  0x1a   :  { %417 = vmatpush.msra.mxu2 %v1274_v16  ;;  %324 = vmatpush.msrb.mxu1 %v1322_v62  ;;  %s1062_s15 = sld [smem:[#allocation6 + $0x3]] }
  0x1b   :  { %572 = vmatpush.msrb.mxu0 %v1274_v16 }
  0x1c   :  { %418 = vmatpush.msra.mxu2 %v1278_v17  ;;  %325 = vmatpush.msrb.mxu1 %v1327_v63 }
  0x1d   :  { %573 = vmatpush.msrb.mxu0 %v1278_v17 }
  0x1e   :  { %419 = vmatpush.msra.mxu2 %v1282_v18  ;;  %326 = vmatpush.msrb.mxu1 %v1332_v0 }
  0x1f   :  { %574 = vmatpush.msrb.mxu0 %v1282_v18 }
  0x20   :  { %420 = vmatpush.msra.mxu2 %v1286_v20  ;;  %327 = vmatpush.msrb.mxu1 %v1337_v1 }
  0x21   :  { %575 = vmatpush.msrb.mxu0 %v1286_v20 }
  0x22   :  { %643 = vmatpush.msrb.mxu2 %v1316_v60  ;;  %328 = vmatpush.msrb.mxu1 %v1342_v2 }
  0x24   :  { %644 = vmatpush.msrb.mxu2 %v1318_v61  ;;  %329 = vmatpush.msrb.mxu1 %v1355_v5 }
  0x26   :  { %645 = vmatpush.msrb.mxu2 %v1322_v62 }
  0x28   :  { %646 = vmatpush.msrb.mxu2 %v1327_v63 }
  0x2a   :  { %647 = vmatpush.msrb.mxu2 %v1332_v0 }
  0x2c   :  { %648 = vmatpush.msrb.mxu2 %v1337_v1 }
  0x2e   :  { %649 = vmatpush.msrb.mxu2 %v1342_v2 }
  0x30   :  { %650 = vmatpush.msrb.mxu2 %v1355_v5 }
  0x94   :  { %v102_v12 = vpop.f32.mrf.mxu2 }
  0x95   :  { %v103_v13 = vadd.f32 %v1072_v11, %v102_v12 }
  0x97   :  { %1079 = vtanh.f32 %v103_v13 }
  0x9c   :  { %v165_v14 = vpop.f32.mrf.mxu2 }
  0x9d   :  { %v1080_v15 = vpop.eup %1079  ;;  %1036 = vmatmul.msk.f32.vlgmr.msra.gmra.mxu3 %vm169_vm6, %v165_v14 }
  0x9e   :  { %1032 = vmatmul.msk.f32.vlgmr.msra.gmra.mxu1 %vm107_vm7, %v1080_v15  ;;  %488 = vmatpush.msra.mxu3 %v1316_v60 }
  0x9f   :  { %798 = vmatpush.msra.mxu1 %v1316_v60 }
  0xa0   :  { %489 = vmatpush.msra.mxu3 %v1318_v61 }
  0xa1   :  { %799 = vmatpush.msra.mxu1 %v1318_v61 }
  0xa2   :  { %490 = vmatpush.msra.mxu3 %v1322_v62 }
  0xa3   :  { %800 = vmatpush.msra.mxu1 %v1322_v62 }
  0xa4   :  { %491 = vmatpush.msra.mxu3 %v1327_v63 }
  0xa5   :  { %801 = vmatpush.msra.mxu1 %v1327_v63 }
  0xa6   :  { %492 = vmatpush.msra.mxu3 %v1332_v0 }
  0xa7   :  { %802 = vmatpush.msra.mxu1 %v1332_v0 }
  0xa8   :  { %493 = vmatpush.msra.mxu3 %v1337_v1 }
  0xa9   :  { %803 = vmatpush.msra.mxu1 %v1337_v1 }
  0xaa   :  { %494 = vmatpush.msra.mxu3 %v1342_v2 }
  0xab   :  { %804 = vmatpush.msra.mxu1 %v1342_v2 }
  0xac   :  { %495 = vmatpush.msra.mxu3 %v1355_v5 }
  0xad   :  { %805 = vmatpush.msra.mxu1 %v1355_v5 }
 0x11b   :  { %v132_v22 = vpop.f32.mrf.mxu1 }
 0x11c   :  { %v133_v23 = vadd.f32 %v1073_v21, %v132_v22 }
 0x11e   :  { %1081 = vtanh.f32 %v133_v23 }
 0x120   :  { %v194_v25 = vpop.f32.mrf.mxu3 }
 0x121   :  { %v195_v26 = vadd.f32 %v1074_v24, %v194_v25 }
 0x123   :  { %1083 = vtanh.f32 %v195_v26 }
 0x124   :  { %v1294_v27 = vpop.eup %1081 }
 0x125   :  { %1040 = vmatmul.msk.f32.vlgmr.msra.gmra.mxu0 %vm230_vm8, %v1294_v27 }
 0x126   :  { %727 = vmatpush.msra.mxu0 %v1274_v16 }
 0x128   :  { %728 = vmatpush.msra.mxu0 %v1278_v17 }
 0x129   :  { %v1084_v28 = vpop.eup %1083 }
 0x12a   :  { %1037 = vmatmul.msk.f32.vlgmr.msrb.gmra.mxu3 %vm199_vm9, %v1084_v28  ;;  %729 = vmatpush.msra.mxu0 %v1282_v18 }
 0x12b   :  { %865 = vmatpush.msrb.mxu3 %v1274_v16 }
 0x12c   :  { %730 = vmatpush.msra.mxu0 %v1286_v20 }
 0x12d   :  { %866 = vmatpush.msrb.mxu3 %v1278_v17 }
 0x12f   :  { %867 = vmatpush.msrb.mxu3 %v1282_v18 }
 0x131   :  { %868 = vmatpush.msrb.mxu3 %v1286_v20 }
 0x1a2   :  { %v251_v35 = vpop.f32.mrf.mxu0 }
 0x1ad   :  { %v220_v31 = vpop.f32.mrf.mxu3 }
 0x1ae   :  { %v1304_v32 = vadd.f32 %v1075_v29, %v220_v31 }
 0x1b0   :  { %v229_v33 = vperm.slane %v1304_v32, 0 }
 0x1b2   :  { %v252_v36 = vadd.f32 %v251_v35, %v229_v33  ;;  %v1078_v33 = vld [vmem:[#allocation2 + $0x38] ss:$0 sm:$0xff] }
 0x1b4   :  { %v256_v37 = vadd.f32 %v255_v34, %v252_v36 }
 0x1b6   :  { %277 = vrot.lane.b32.xlu0 %v256_v37, %s1223_s1  ;;  %v1041_v38 = vmul.f32 -1.442695, %v256_v37 }
 0x1b8   :  { %1085 = vpow2.f32 %v1041_v38 }
 0x1be   :  { %v1086_v39 = vpop.eup %1085 }
 0x1bf   :  { %v260_v40 = vadd.f32 1.0, %v1086_v39 }
 0x1c1   :  { %1087 = vrcp.f32 %v260_v40  ;;  %v272_v46 = vand.u32 2147483648, %v260_v40  ;;  %vm266_vm11 = vweird.f32 %v260_v40  ;;  %v270_v47 = vand.u32 2147483647, %v260_v40 }
 0x1c3   :  { %v273_v49 = vor.u32 1.1754944e-38, %v272_v46  ;;  %vm271_vm13 = vcmp.eq.f32.partialorder %v270_v47, 8.507059e+37 }
 0x1c7   :  { %v1088_v41 = vpop.eup %1087 }
 0x1c8   :  { %v262_v42 = vmul.f32 %v1088_v41, %v260_v40  ;;  %vm267_vm10 = vweird.f32 %v1088_v41 }
 0x1c9   :  { %vm268_vm12 = vmor %vm266_vm11, %vm267_vm10 }
 0x1ca   :  { %v263_v43 = vsub.f32 1.0, %v262_v42 }
 0x1cc   :  { %v264_v44 = vmul.f32 %v1088_v41, %v263_v43 }
 0x1ce   :  { %v265_v45 = vadd.f32 %v1088_v41, %v264_v44  ;;  %v1393_v44 = vstv %s1028_s8 }
 0x1d0   :  { %v269_v48 = vsel %vm268_vm12, %v1088_v41, %v265_v45 }
 0x1d1   :  { %v274_v51 = vsel %vm271_vm13, %v273_v49, %v269_v48  ;;  %v402_v48 = vperm.slane %v1304_v32, 1 }
 0x228   :  { %v278_v50 = vpop.permute.xlu0 %277 }
 0x229   :  { %v280_v52 = vmul.f32 %v278_v50, %v274_v51 }
 0x22b   :  { %282 = vrot.lane.b32.xlu0 %v280_v52, %s1224_s7 }
 0x233   :  { %306 = vrot.lane.b32.xlu0 %v1294_v27, %s1223_s1 }
 0x29d   :  { %v283_v53 = vpop.permute.xlu0 %282 }
 0x29e   :  { %v285_v54 = vadd.f32 %v283_v53, %v256_v37 }
 0x2a0   :  { %1089 = vtanh.f32 %v285_v54 }
 0x2a5   :  { %v307_v6 = vpop.permute.xlu0 %306 }
 0x2a6   :  { %v1090_v55 = vpop.eup %1089 }
 0x2a7   :  { %288 = vrot.lane.b32.xlu1 %v1090_v55, %s1224_s7 }
 0x319   :  { %v289_v56 = vpop.permute.xlu1 %288 }
 0x31a   :  { %v291_v57 = vsub.f32 %v1294_v27, %v289_v56 }
 0x31c   :  { %293 = vrot.lane.b32.xlu1 %v291_v57, %s1223_s1 }
 0x38e   :  { %v294_v58 = vpop.permute.xlu1 %293 }
 0x38f   :  { %v296_v59 = vmul.f32 %v294_v58, %v274_v51 }
 0x391   :  { %298 = vrot.lane.b32.xlu2 %v296_v59, %s1223_s1 }
 0x3eb   :  { %v299_v3 = vpop.permute.xlu2 %298 }
 0x3ec   :  { %v1351_v4 = vadd.f32 %v1090_v55, %v299_v3 }
 0x3ee   :  { %303 = vrot.lane.b32.xlu2 %v1351_v4, %s1224_s7 }
 0x448   :  { %v304_v7 = vpop.permute.xlu2 %303 }
 0x449   :  { %v309_v8 = vsel %vm230_vm8, %v304_v7, %v307_v6  ;;  %1044 = vmatmul.msk.f32.vlgmr.msra.gmra.mxu2 %vm230_vm8, %v304_v7 }
 0x44a   :  { %1042 = vmatmul.msk.f32.vlgmr.msrb.gmra.mxu1 %vm310_vm14, %v309_v8 }
 0x4c7   :  { %v331_v10 = vpop.f32.mrf.mxu1 }
 0x4c8   :  { %v332_v11 = vadd.f32 %v1375_v9, %v331_v10 }
 0x4ca   :  { %354 = vrot.lane.b32.xlu1 %v332_v11, %s1223_s1  ;;  %v1043_v12 = vmul.f32 -1.442695, %v332_v11 }
 0x4cc   :  { %1091 = vpow2.f32 %v1043_v12  ;;  %v422_v47 = vpop.f32.mrf.mxu2 }
 0x4cd   :  { %v423_v50 = vadd.f32 %v422_v47, %v402_v48 }
 0x4d2   :  { %v1092_v13 = vpop.eup %1091 }
 0x4d3   :  { %v337_v14 = vadd.f32 1.0, %v1092_v13 }
 0x4d5   :  { %1093 = vrcp.f32 %v337_v14  ;;  %v349_v20 = vand.u32 2147483648, %v337_v14  ;;  %vm343_vm0 = vweird.f32 %v337_v14  ;;  %v347_v21 = vand.u32 2147483647, %v337_v14 }
 0x4d7   :  { %v350_v23 = vor.u32 1.1754944e-38, %v349_v20  ;;  %vm348_vm2 = vcmp.eq.f32.partialorder %v347_v21, 8.507059e+37 }
 0x4db   :  { %v1094_v15 = vpop.eup %1093 }
 0x4dc   :  { %v339_v16 = vmul.f32 %v1094_v15, %v337_v14  ;;  %vm344_vm15 = vweird.f32 %v1094_v15 }
 0x4dd   :  { %vm345_vm1 = vmor %vm343_vm0, %vm344_vm15  ;;  %vm551_vm15 = vcmask 11272  }
 0x4de   :  { %v340_v17 = vsub.f32 1.0, %v339_v16 }
 0x4e0   :  { %v341_v18 = vmul.f32 %v1094_v15, %v340_v17 }
 0x4e2   :  { %v342_v19 = vadd.f32 %v1094_v15, %v341_v18 }
 0x4e4   :  { %v346_v22 = vsel %vm345_vm1, %v1094_v15, %v342_v19 }
 0x4e5   :  { %v351_v25 = vsel %vm348_vm2, %v350_v23, %v346_v22 }
 0x53c   :  { %v355_v24 = vpop.permute.xlu1 %354 }
 0x53d   :  { %v357_v26 = vmul.f32 %v355_v24, %v351_v25 }
 0x53f   :  { %359 = vrot.lane.b32.xlu2 %v357_v26, %s1224_s7 }
 0x599   :  { %v360_v28 = vpop.permute.xlu2 %359 }
 0x59a   :  { %v362_v29 = vadd.f32 %v360_v28, %v332_v11 }
 0x59c   :  { %1095 = vtanh.f32 %v362_v29 }
 0x5a2   :  { %v1096_v31 = vpop.eup %1095 }
 0x5a3   :  { %365 = vrot.lane.b32.xlu0 %v1096_v31, %s1224_s7 }
 0x5ab   :  { %381 = vrot.lane.b32.xlu0 %v1078_v33, %s1224_s7 }
 0x615   :  { %v366_v34 = vpop.permute.xlu0 %365 }
 0x616   :  { %v368_v35 = vsub.f32 %v1294_v27, %v366_v34 }
 0x618   :  { %370 = vrot.lane.b32.xlu1 %v368_v35, %s1223_s1 }
 0x61d   :  { %v1385_v39 = vpop.permute.xlu0 %381 }
 0x68a   :  { %v371_v36 = vpop.permute.xlu1 %370 }
 0x68b   :  { %v373_v37 = vmul.f32 %v371_v36, %v351_v25 }
 0x68d   :  { %375 = vrot.lane.b32.xlu2 %v373_v37, %s1223_s1 }
 0x6e7   :  { %v376_v38 = vpop.permute.xlu2 %375 }
 0x6e8   :  { %v1387_v40 = vadd.f32 %v1096_v31, %v376_v38 }
 0x6ea   :  { %v384_v41 = vmul.f32 %v1385_v39, %v1387_v40 }
 0x6ec   :  { %386 = vrot.lane.b32.xlu1 %v384_v41, %s1224_s7 }
 0x75e   :  { %v387_v42 = vpop.permute.xlu1 %386 }
 0x75f   :  { %v390_v43 = vsel %vm389_vm3, %v387_v42, 0.0 }
 0x760   :  { %391 = vadd.xlane.f32.xlu2 %v390_v43 }
 0x7d3   :  { %v392_v45 = vpop.xlane.xlu2 %391 }
 0x7d4   :  { %v394_v46 = vadd.f32 %v1393_v44, %v392_v45 }
 0x7d6   :  { %1097 = vtanh.f32 %v394_v46 }
 0x7dc   :  { %v1397_v49 = vpop.eup %1097 }
 0x7dd   :  { %v425_v51 = vmul.f32 %v1397_v49, %v1302_v30  ;;  %397 = vst.msk [vmem:[#allocation7] sm:$0xf] %vm396_vm4, %v1397_v49 }
 0x7df   :  { %v426_v52 = vadd.f32 %v425_v51, %v423_v50 }
 0x7e1   :  { %447 = vrot.lane.b32.xlu0 %v426_v52, %s1223_s1  ;;  %v1045_v53 = vmul.f32 -1.442695, %v426_v52 }
 0x7e3   :  { %1099 = vpow2.f32 %v1045_v53  ;;  %v399_v53 = vstv %s398_s11 }
 0x7e9   :  { %v1100_v54 = vpop.eup %1099 }
 0x7ea   :  { %v430_v55 = vadd.f32 1.0, %v1100_v54 }
 0x7ec   :  { %1101 = vrcp.f32 %v430_v55  ;;  %v442_v6 = vand.u32 2147483648, %v430_v55  ;;  %vm436_vm6 = vweird.f32 %v430_v55  ;;  %v440_v7 = vand.u32 2147483647, %v430_v55 }
 0x7ee   :  { %v443_v10 = vor.u32 1.1754944e-38, %v442_v6  ;;  %vm441_vm9 = vcmp.eq.f32.partialorder %v440_v7, 8.507059e+37 }
 0x7f2   :  { %v1102_v56 = vpop.eup %1101 }
 0x7f3   :  { %v432_v57 = vmul.f32 %v1102_v56, %v430_v55  ;;  %vm437_vm5 = vweird.f32 %v1102_v56  ;;  %v227_v55 = vstv %s1039_s12 }
 0x7f4   :  { %vm438_vm7 = vmor %vm436_vm6, %vm437_vm5 }
 0x7f5   :  { %v433_v58 = vsub.f32 1.0, %v432_v57 }
 0x7f7   :  { %v434_v59 = vmul.f32 %v1102_v56, %v433_v58  ;;  %v554_v58 = vstv %s1048_s13 }
 0x7f9   :  { %v435_v3 = vadd.f32 %v1102_v56, %v434_v59  ;;  %v557_v59 = vperm.slane %v1304_v32, 2 }
 0x7fb   :  { %v439_v8 = vsel %vm438_vm7, %v1102_v56, %v435_v3  ;;  %v400_v56 = vmul.f32 %v1397_v49, %v399_v53 }
 0x7fc   :  { %v444_v12 = vsel %vm441_vm9, %v443_v10, %v439_v8 }
 0x853   :  { %v448_v11 = vpop.permute.xlu0 %447 }
 0x854   :  { %v450_v13 = vmul.f32 %v448_v11, %v444_v12 }
 0x856   :  { %452 = vrot.lane.b32.xlu1 %v450_v13, %s1224_s7 }
 0x8c8   :  { %v453_v14 = vpop.permute.xlu1 %452 }
 0x8c9   :  { %v455_v15 = vadd.f32 %v453_v14, %v426_v52  ;;  %v224_v52 = vstv %s1038_s10 }
 0x8ca   :  { %v225_v54 = vmul.f32 %v1294_v27, %v224_v52 }
 0x8cb   :  { %1103 = vtanh.f32 %v455_v15 }
 0x8cc   :  { %v228_v3 = vadd.f32 %v227_v55, %v225_v54 }
 0x8ce   :  { %v401_v10 = vadd.f32 %v400_v56, %v228_v3 }
 0x8d1   :  { %v1104_v16 = vpop.eup %1103 }
 0x8d2   :  { %v457_v17 = vsub.f32 %v1351_v4, %v1104_v16 }
 0x8d4   :  { %459 = vrot.lane.b32.xlu0 %v457_v17, %s1225_s9 }
 0x946   :  { %v460_v18 = vpop.permute.xlu0 %459 }
 0x947   :  { %v462_v19 = vmul.f32 %v460_v18, %v444_v12 }
 0x949   :  { %464 = vrot.lane.b32.xlu1 %v462_v19, %s1223_s1 }
 0x951   :  { %473 = vrot.lane.b32.xlu1 %v1387_v40, %s1225_s9 }
 0x9bb   :  { %v465_v20 = vpop.permute.xlu1 %464 }
 0x9bc   :  { %v1409_v21 = vadd.f32 %v1104_v16, %v465_v20 }
 0x9be   :  { %469 = vrot.lane.b32.xlu0 %v1409_v21, %s1224_s7 }
 0x9c3   :  { %v474_v22 = vpop.permute.xlu1 %473 }
 0xa30   :  { %v470_v23 = vpop.permute.xlu0 %469 }
 0xa31   :  { %v476_v4 = vsel %vm230_vm8, %v470_v23, %v474_v22  ;;  %1049 = vmatmul.msk.f32.vlgmr.msrb.gmra.mxu0 %vm230_vm8, %v470_v23 }
 0xa32   :  { %1046 = vmatmul.msk.f32.vlgmr.msra.gmra.mxu3 %vm310_vm14, %v476_v4  ;;  %935 = vmatpush.msrb.mxu0 %v1316_v60 }
 0xa34   :  { %936 = vmatpush.msrb.mxu0 %v1318_v61 }
 0xa36   :  { %937 = vmatpush.msrb.mxu0 %v1322_v62 }
 0xa38   :  { %938 = vmatpush.msrb.mxu0 %v1327_v63 }
 0xa3a   :  { %939 = vmatpush.msrb.mxu0 %v1332_v0 }
 0xa3c   :  { %940 = vmatpush.msrb.mxu0 %v1337_v1 }
 0xa3e   :  { %941 = vmatpush.msrb.mxu0 %v1342_v2 }
 0xa40   :  { %942 = vmatpush.msrb.mxu0 %v1355_v5 }
 0xaae   :  { %v577_v57 = vpop.f32.mrf.mxu0 }
 0xaaf   :  { %v578_v7 = vadd.f32 %v577_v57, %v557_v59 }
 0xab5   :  { %v497_v24 = vpop.f32.mrf.mxu3 }
 0xab6   :  { %v498_v25 = vadd.f32 %v1375_v9, %v497_v24 }
 0xab8   :  { %520 = vrot.lane.b32.xlu0 %v498_v25, %s1223_s1  ;;  %v1047_v60 = vmul.f32 -1.442695, %v498_v25 }
 0xaba   :  { %1105 = vpow2.f32 %v1047_v60 }
 0xac0   :  { %v1106_v61 = vpop.eup %1105 }
 0xac1   :  { %v503_v26 = vadd.f32 1.0, %v1106_v61 }
 0xac3   :  { %1107 = vrcp.f32 %v503_v26  ;;  %v515_v1 = vand.u32 2147483648, %v503_v26  ;;  %vm509_vm11 = vweird.f32 %v503_v26  ;;  %v513_v2 = vand.u32 2147483647, %v503_v26 }
 0xac5   :  { %v516_v31 = vor.u32 1.1754944e-38, %v515_v1  ;;  %vm514_vm13 = vcmp.eq.f32.partialorder %v513_v2, 8.507059e+37 }
 0xac9   :  { %v1108_v62 = vpop.eup %1107 }
 0xaca   :  { %v505_v63 = vmul.f32 %v1108_v62, %v503_v26  ;;  %vm510_vm10 = vweird.f32 %v1108_v62 }
 0xacb   :  { %vm511_vm12 = vmor %vm509_vm11, %vm510_vm10  ;;  %vm706_vm10 = vcmask 19472  }
 0xacc   :  { %v506_v28 = vsub.f32 1.0, %v505_v63 }
 0xace   :  { %v507_v0 = vmul.f32 %v1108_v62, %v506_v28 }
 0xad0   :  { %v508_v29 = vadd.f32 %v1108_v62, %v507_v0 }
 0xad2   :  { %v512_v5 = vsel %vm511_vm12, %v1108_v62, %v508_v29 }
 0xad3   :  { %v517_v34 = vsel %vm514_vm13, %v516_v31, %v512_v5 }
 0xb2a   :  { %v521_v33 = vpop.permute.xlu0 %520 }
 0xb2b   :  { %v523_v35 = vmul.f32 %v521_v33, %v517_v34 }
 0xb2d   :  { %525 = vrot.lane.b32.xlu1 %v523_v35, %s1224_s7 }
 0xb9f   :  { %v526_v36 = vpop.permute.xlu1 %525 }
 0xba0   :  { %v528_v37 = vadd.f32 %v526_v36, %v498_v25 }
 0xba2   :  { %1109 = vtanh.f32 %v528_v37 }
 0xba8   :  { %v1110_v38 = vpop.eup %1109 }
 0xba9   :  { %v530_v41 = vsub.f32 %v1387_v40, %v1110_v38 }
 0xbab   :  { %532 = vrot.lane.b32.xlu0 %v530_v41, %s1225_s9 }
 0xc1d   :  { %v533_v42 = vpop.permute.xlu0 %532 }
 0xc1e   :  { %v535_v43 = vmul.f32 %v533_v42, %v517_v34 }
 0xc20   :  { %537 = vrot.lane.b32.xlu1 %v535_v43, %s1223_s1 }
 0xc92   :  { %v538_v45 = vpop.permute.xlu1 %537 }
 0xc93   :  { %v1430_v46 = vadd.f32 %v1110_v38, %v538_v45 }
 0xc95   :  { %v541_v47 = vmul.f32 %v1430_v46, %v1385_v39 }
 0xc97   :  { %543 = vrot.lane.b32.xlu2 %v541_v47, %s1224_s7 }
 0xcf1   :  { %v544_v48 = vpop.permute.xlu2 %543 }
 0xcf2   :  { %v546_v50 = vsel %vm389_vm3, %v544_v48, 0.0 }
 0xcf3   :  { %547 = vadd.xlane.f32.xlu0 %v546_v50 }
 0xd66   :  { %v548_v40 = vpop.xlane.xlu0 %547 }
 0xd67   :  { %v549_v51 = vadd.f32 %v548_v40, %v1393_v44 }
 0xd69   :  { %1111 = vtanh.f32 %v549_v51 }
 0xd6f   :  { %v1112_v6 = vpop.eup %1111 }
 0xd70   :  { %v580_v8 = vmul.f32 %v1112_v6, %v1302_v30  ;;  %v555_v11 = vmul.f32 %v1112_v6, %v554_v58  ;;  %552 = vst.msk [vmem:[#allocation7] sm:$0xf] %vm551_vm15, %v1112_v6 }
 0xd72   :  { %v581_v12 = vadd.f32 %v580_v8, %v578_v7  ;;  %v1441_v13 = vadd.f32 %v555_v11, %v401_v10 }
 0xd74   :  { %602 = vrot.lane.b32.xlu1 %v581_v12, %s1223_s1  ;;  %v1050_v27 = vmul.f32 -1.442695, %v581_v12 }
 0xd76   :  { %1113 = vpow2.f32 %v1050_v27  ;;  %v712_v27 = vperm.slane %v1304_v32, 3 }
 0xd7c   :  { %v1114_v49 = vpop.eup %1113 }
 0xd7d   :  { %v585_v14 = vadd.f32 1.0, %v1114_v49 }
 0xd7f   :  { %1115 = vrcp.f32 %v585_v14  ;;  %v597_v20 = vand.u32 2147483648, %v585_v14  ;;  %vm591_vm1 = vweird.f32 %v585_v14  ;;  %v595_v22 = vand.u32 2147483647, %v585_v14 }
 0xd81   :  { %v598_v4 = vor.u32 1.1754944e-38, %v597_v20  ;;  %vm596_vm4 = vcmp.eq.f32.partialorder %v595_v22, 8.507059e+37 }
 0xd85   :  { %v1116_v15 = vpop.eup %1115 }
 0xd86   :  { %v587_v16 = vmul.f32 %v1116_v15, %v585_v14  ;;  %vm592_vm0 = vweird.f32 %v1116_v15 }
 0xd87   :  { %vm593_vm2 = vmor %vm591_vm1, %vm592_vm0 }
 0xd88   :  { %v588_v17 = vsub.f32 1.0, %v587_v16 }
 0xd8a   :  { %v589_v18 = vmul.f32 %v1116_v15, %v588_v17 }
 0xd8c   :  { %v590_v19 = vadd.f32 %v1116_v15, %v589_v18 }
 0xd8e   :  { %v594_v23 = vsel %vm593_vm2, %v1116_v15, %v590_v19 }
 0xd8f   :  { %v599_v25 = vsel %vm596_vm4, %v598_v4, %v594_v23 }
 0xde6   :  { %v603_v24 = vpop.permute.xlu1 %602 }
 0xde7   :  { %v605_v60 = vmul.f32 %v603_v24, %v599_v25 }
 0xde9   :  { %607 = vrot.lane.b32.xlu1 %v605_v60, %s1224_s7 }
 0xe5b   :  { %v608_v61 = vpop.permute.xlu1 %607 }
 0xe5c   :  { %v610_v26 = vadd.f32 %v608_v61, %v581_v12  ;;  %v709_v12 = vstv %s1053_s14 }
 0xe5e   :  { %1117 = vtanh.f32 %v610_v26 }
 0xe64   :  { %v1118_v62 = vpop.eup %1117 }
 0xe65   :  { %v612_v63 = vsub.f32 %v1409_v21, %v1118_v62 }
 0xe67   :  { %614 = vrot.lane.b32.xlu1 %v612_v63, %s1225_s9 }
 0xed9   :  { %v615_v28 = vpop.permute.xlu1 %614 }
 0xeda   :  { %v617_v0 = vmul.f32 %v615_v28, %v599_v25 }
 0xedc   :  { %619 = vrot.lane.b32.xlu2 %v617_v0, %s1223_s1 }
 0xee4   :  { %628 = vrot.lane.b32.xlu2 %v1430_v46, %s1225_s9 }
 0xf36   :  { %v620_v29 = vpop.permute.xlu2 %619 }
 0xf37   :  { %v1450_v1 = vadd.f32 %v1118_v62, %v620_v29 }
 0xf39   :  { %624 = vrot.lane.b32.xlu1 %v1450_v1, %s1224_s7 }
 0xf3e   :  { %v629_v2 = vpop.permute.xlu2 %628 }
 0xfab   :  { %v625_v5 = vpop.permute.xlu1 %624 }
 0xfac   :  { %v631_v31 = vsel %vm230_vm8, %v625_v5, %v629_v2  ;;  %1054 = vmatmul.msk.f32.vlgmr.msra.gmra.mxu0 %vm230_vm8, %v625_v5 }
 0xfad   :  { %1051 = vmatmul.msk.f32.vlgmr.msrb.gmra.mxu2 %vm310_vm14, %v631_v31 }
0x1029   :  { %v732_v11 = vpop.f32.mrf.mxu0 }
0x102a   :  { %v733_v14 = vadd.f32 %v732_v11, %v712_v27 }
0x1030   :  { %v652_v21 = vpop.f32.mrf.mxu2 }
0x1031   :  { %v653_v33 = vadd.f32 %v1375_v9, %v652_v21 }
0x1033   :  { %675 = vrot.lane.b32.xlu1 %v653_v33, %s1223_s1  ;;  %v1052_v34 = vmul.f32 -1.442695, %v653_v33 }
0x1035   :  { %1119 = vpow2.f32 %v1052_v34 }
0x103b   :  { %v1120_v35 = vpop.eup %1119 }
0x103c   :  { %v658_v36 = vadd.f32 1.0, %v1120_v35 }
0x103e   :  { %1121 = vrcp.f32 %v658_v36  ;;  %v670_v45 = vand.u32 2147483648, %v658_v36  ;;  %vm664_vm6 = vweird.f32 %v658_v36  ;;  %v668_v47 = vand.u32 2147483647, %v658_v36 }
0x1040   :  { %v671_v50 = vor.u32 1.1754944e-38, %v670_v45  ;;  %vm669_vm9 = vcmp.eq.f32.partialorder %v668_v47, 8.507059e+37 }
0x1044   :  { %v1122_v37 = vpop.eup %1121 }
0x1045   :  { %v660_v38 = vmul.f32 %v1122_v37, %v658_v36  ;;  %vm665_vm5 = vweird.f32 %v1122_v37 }
0x1046   :  { %vm666_vm7 = vmor %vm664_vm6, %vm665_vm5 }
0x1047   :  { %v661_v41 = vsub.f32 1.0, %v660_v38 }
0x1049   :  { %v662_v42 = vmul.f32 %v1122_v37, %v661_v41 }
0x104b   :  { %v663_v43 = vadd.f32 %v1122_v37, %v662_v42 }
0x104d   :  { %v667_v48 = vsel %vm666_vm7, %v1122_v37, %v663_v43 }
0x104e   :  { %v672_v51 = vsel %vm669_vm9, %v671_v50, %v667_v48 }
0x10a5   :  { %v676_v40 = vpop.permute.xlu1 %675 }
0x10a6   :  { %v678_v52 = vmul.f32 %v676_v40, %v672_v51 }
0x10a8   :  { %680 = vrot.lane.b32.xlu2 %v678_v52, %s1224_s7 }
0x1102   :  { %v681_v53 = vpop.permute.xlu2 %680 }
0x1103   :  { %v683_v54 = vadd.f32 %v681_v53, %v653_v33 }
0x1105   :  { %1123 = vtanh.f32 %v683_v54 }
0x110b   :  { %v1124_v55 = vpop.eup %1123 }
0x110c   :  { %v685_v56 = vsub.f32 %v1430_v46, %v1124_v55 }
0x110e   :  { %687 = vrot.lane.b32.xlu1 %v685_v56, %s1225_s9 }
0x1180   :  { %v688_v57 = vpop.permute.xlu1 %687 }
0x1181   :  { %v690_v58 = vmul.f32 %v688_v57, %v672_v51 }
0x1183   :  { %692 = vrot.lane.b32.xlu2 %v690_v58, %s1223_s1 }
0x11dd   :  { %v693_v59 = vpop.permute.xlu2 %692 }
0x11de   :  { %v1463_v3 = vadd.f32 %v1124_v55, %v693_v59 }
0x11e0   :  { %v696_v6 = vmul.f32 %v1463_v3, %v1385_v39 }
0x11e2   :  { %698 = vrot.lane.b32.xlu0 %v696_v6, %s1224_s7 }
0x1254   :  { %v699_v7 = vpop.permute.xlu0 %698 }
0x1255   :  { %v701_v8 = vsel %vm389_vm3, %v699_v7, 0.0 }
0x1256   :  { %702 = vadd.xlane.f32.xlu1 %v701_v8 }
0x12c9   :  { %v703_v46 = vpop.xlane.xlu1 %702 }
0x12ca   :  { %v704_v10 = vadd.f32 %v703_v46, %v1393_v44 }
0x12cc   :  { %1125 = vtanh.f32 %v704_v10 }
0x12d2   :  { %v1126_v49 = vpop.eup %1125 }
0x12d3   :  { %v735_v15 = vmul.f32 %v1126_v49, %v1302_v30  ;;  %v710_v16 = vmul.f32 %v1126_v49, %v709_v12  ;;  %707 = vst.msk [vmem:[#allocation7] sm:$0xf] %vm706_vm10, %v1126_v49 }
0x12d5   :  { %v736_v17 = vadd.f32 %v735_v15, %v733_v14  ;;  %v1473_v18 = vadd.f32 %v710_v16, %v1441_v13 }
0x12d7   :  { %757 = vrot.lane.b32.xlu2 %v736_v17, %s1223_s1  ;;  %v1055_v19 = vmul.f32 -1.442695, %v736_v17 }
0x12d9   :  { %1127 = vpow2.f32 %v1055_v19 }
0x12df   :  { %v1128_v20 = vpop.eup %1127 }
0x12e0   :  { %v740_v22 = vadd.f32 1.0, %v1128_v20 }
0x12e2   :  { %1129 = vrcp.f32 %v740_v22  ;;  %v752_v30 = vand.u32 2147483648, %v740_v22  ;;  %vm746_vm12 = vweird.f32 %v740_v22  ;;  %v750_v60 = vand.u32 2147483647, %v740_v22 }
0x12e4   :  { %v753_v13 = vor.u32 1.1754944e-38, %v752_v30  ;;  %vm751_vm15 = vcmp.eq.f32.partialorder %v750_v60, 8.507059e+37 }
0x12e8   :  { %v1130_v23 = vpop.eup %1129 }
0x12e9   :  { %v742_v4 = vmul.f32 %v1130_v23, %v740_v22  ;;  %vm747_vm11 = vweird.f32 %v1130_v23 }
0x12ea   :  { %vm748_vm13 = vmor %vm746_vm12, %vm747_vm11  ;;  %vm998_vm12 = vcmask 27672  }
0x12eb   :  { %v743_v32 = vsub.f32 1.0, %v742_v4 }
0x12ed   :  { %v744_v24 = vmul.f32 %v1130_v23, %v743_v32 }
0x12ef   :  { %v745_v25 = vadd.f32 %v1130_v23, %v744_v24 }
0x12f1   :  { %v749_v61 = vsel %vm748_vm13, %v1130_v23, %v745_v25 }
0x12f2   :  { %v754_v62 = vsel %vm751_vm15, %v753_v13, %v749_v61 }
0x1331   :  { %v758_v26 = vpop.permute.xlu2 %757 }
0x1332   :  { %v760_v63 = vmul.f32 %v758_v26, %v754_v62 }
0x1334   :  { %762 = vrot.lane.b32.xlu2 %v760_v63, %s1224_s7 }
0x138e   :  { %v763_v28 = vpop.permute.xlu2 %762 }
0x138f   :  { %v765_v0 = vadd.f32 %v763_v28, %v736_v17 }
0x1391   :  { %1131 = vtanh.f32 %v765_v0 }
0x1397   :  { %v1132_v29 = vpop.eup %1131 }
0x1398   :  { %v767_v2 = vsub.f32 %v1450_v1, %v1132_v29 }
0x139a   :  { %769 = vrot.lane.b32.xlu0 %v767_v2, %s1225_s9 }
0x140c   :  { %v770_v5 = vpop.permute.xlu0 %769 }
0x140d   :  { %v772_v31 = vmul.f32 %v770_v5, %v754_v62 }
0x140f   :  { %774 = vrot.lane.b32.xlu2 %v772_v31, %s1223_s1 }
0x1417   :  { %783 = vrot.lane.b32.xlu2 %v1463_v3, %s1225_s9 }
0x1469   :  { %v775_v21 = vpop.permute.xlu2 %774 }
0x146a   :  { %v1482_v33 = vadd.f32 %v1132_v29, %v775_v21 }
0x146c   :  { %779 = vrot.lane.b32.xlu0 %v1482_v33, %s1224_s7 }
0x1471   :  { %v784_v34 = vpop.permute.xlu2 %783 }
0x14de   :  { %v780_v35 = vpop.permute.xlu0 %779 }
0x14df   :  { %v786_v36 = vsel %vm230_vm8, %v780_v35, %v784_v34  ;;  %1058 = vmatmul.msk.f32.vlgmr.msrb.gmra.mxu3 %vm230_vm8, %v780_v35 }
0x14e0   :  { %1056 = vmatmul.msk.f32.vlgmr.msra.gmra.mxu1 %vm310_vm14, %v786_v36 }
0x155d   :  { %v807_v1 = vpop.f32.mrf.mxu1 }
0x155e   :  { %v808_v37 = vadd.f32 %v1375_v9, %v807_v1 }
0x1560   :  { %830 = vrot.lane.b32.xlu0 %v808_v37, %s1223_s1  ;;  %v1057_v48 = vmul.f32 -1.442695, %v808_v37 }
0x1562   :  { %v870_v38 = vpop.f32.mrf.mxu3 }
0x1563   :  { %v871_v41 = vadd.f32 %v870_v38, %v712_v27 }
0x1565   :  { %v873_v42 = vadd.f32 %v871_v41, %v735_v15 }
0x1567   :  { %894 = vrot.lane.b32.xlu2 %v873_v42, %s1223_s1  ;;  %v1059_v43 = vmul.f32 -1.442695, %v873_v42 }
0x1569   :  { %1133 = vpow2.f32 %v1059_v43 }
0x156f   :  { %v1134_v45 = vpop.eup %1133 }
0x1570   :  { %v877_v47 = vadd.f32 1.0, %v1134_v45 }
0x1572   :  { %1135 = vrcp.f32 %v877_v47  ;;  %v889_v56 = vand.u32 2147483648, %v877_v47  ;;  %vm883_vm1 = vweird.f32 %v877_v47  ;;  %v887_v58 = vand.u32 2147483647, %v877_v47 }
0x1573   :  { %1137 = vpow2.f32 %v1057_v48 }
0x1574   :  { %v890_v6 = vor.u32 1.1754944e-38, %v889_v56  ;;  %vm888_vm4 = vcmp.eq.f32.partialorder %v887_v58, 8.507059e+37 }
0x1578   :  { %v1136_v50 = vpop.eup %1135 }
0x1579   :  { %v879_v40 = vmul.f32 %v1136_v50, %v877_v47  ;;  %v1138_v51 = vpop.eup %1137  ;;  %vm884_vm0 = vweird.f32 %v1136_v50 }
0x157a   :  { %v813_v52 = vadd.f32 1.0, %v1138_v51  ;;  %vm885_vm2 = vmor %vm883_vm1, %vm884_vm0 }
0x157b   :  { %v880_v53 = vsub.f32 1.0, %v879_v40 }
0x157c   :  { %1139 = vrcp.f32 %v813_v52  ;;  %v825_v49 = vand.u32 2147483648, %v813_v52  ;;  %vm819_vm6 = vweird.f32 %v813_v52  ;;  %v823_v14 = vand.u32 2147483647, %v813_v52 }
0x157d   :  { %v881_v54 = vmul.f32 %v1136_v50, %v880_v53 }
0x157e   :  { %v826_v16 = vor.u32 1.1754944e-38, %v825_v49  ;;  %vm824_vm9 = vcmp.eq.f32.partialorder %v823_v14, 8.507059e+37 }
0x157f   :  { %v882_v55 = vadd.f32 %v1136_v50, %v881_v54 }
0x1581   :  { %v886_v59 = vsel %vm885_vm2, %v1136_v50, %v882_v55 }
0x1582   :  { %v1140_v57 = vpop.eup %1139  ;;  %v891_v8 = vsel %vm888_vm4, %v890_v6, %v886_v59 }
0x1583   :  { %v815_v7 = vmul.f32 %v1140_v57, %v813_v52  ;;  %vm820_vm5 = vweird.f32 %v1140_v57 }
0x1584   :  { %vm821_vm7 = vmor %vm819_vm6, %vm820_vm5 }
0x1585   :  { %v816_v11 = vsub.f32 1.0, %v815_v7 }
0x1587   :  { %v817_v12 = vmul.f32 %v1140_v57, %v816_v11 }
0x1589   :  { %v818_v27 = vadd.f32 %v1140_v57, %v817_v12 }
0x158b   :  { %v822_v15 = vsel %vm821_vm7, %v1140_v57, %v818_v27 }
0x158c   :  { %v827_v19 = vsel %vm824_vm9, %v826_v16, %v822_v15 }
0x15c1   :  { %v895_v46 = vpop.permute.xlu2 %894 }
0x15c2   :  { %v897_v10 = vmul.f32 %v895_v46, %v891_v8  ;;  %v1001_v46 = vstv %s1062_s15 }
0x15c4   :  { %899 = vrot.lane.b32.xlu2 %v897_v10, %s1224_s7 }
0x15d2   :  { %v831_v17 = vpop.permute.xlu0 %830 }
0x15d3   :  { %v833_v20 = vmul.f32 %v831_v17, %v827_v19 }
0x15d5   :  { %835 = vrot.lane.b32.xlu0 %v833_v20, %s1224_s7 }
0x161e   :  { %v900_v22 = vpop.permute.xlu2 %899 }
0x161f   :  { %v902_v23 = vadd.f32 %v900_v22, %v873_v42 }
0x1621   :  { %1141 = vtanh.f32 %v902_v23 }
0x1627   :  { %v1142_v4 = vpop.eup %1141 }
0x1628   :  { %v904_v32 = vsub.f32 %v1482_v33, %v1142_v4 }
0x162a   :  { %906 = vrot.lane.b32.xlu0 %v904_v32, %s1225_s9 }
0x1647   :  { %v836_v24 = vpop.permute.xlu0 %835 }
0x1648   :  { %v838_v25 = vadd.f32 %v836_v24, %v808_v37 }
0x164a   :  { %1143 = vtanh.f32 %v838_v25 }
0x1650   :  { %v1144_v30 = vpop.eup %1143 }
0x1651   :  { %v840_v60 = vsub.f32 %v1463_v3, %v1144_v30 }
0x1653   :  { %842 = vrot.lane.b32.xlu1 %v840_v60, %s1225_s9 }
0x169c   :  { %v907_v61 = vpop.permute.xlu0 %906 }
0x169d   :  { %v909_v13 = vmul.f32 %v907_v61, %v891_v8 }
0x169f   :  { %911 = vrot.lane.b32.xlu0 %v909_v13, %s1223_s1 }
0x16c5   :  { %v843_v26 = vpop.permute.xlu1 %842 }
0x16c6   :  { %v845_v62 = vmul.f32 %v843_v26, %v827_v19 }
0x16c8   :  { %847 = vrot.lane.b32.xlu2 %v845_v62, %s1223_s1 }
0x1711   :  { %v912_v63 = vpop.permute.xlu0 %911 }
0x1712   :  { %v914_v28 = vadd.f32 %v1142_v4, %v912_v63 }
0x1714   :  { %916 = vrot.lane.b32.xlu2 %v914_v28, %s1224_s7 }
0x1722   :  { %v848_v0 = vpop.permute.xlu2 %847 }
0x1723   :  { %v850_v29 = vadd.f32 %v1144_v30, %v848_v0 }
0x1725   :  { %920 = vrot.lane.b32.xlu0 %v850_v29, %s1225_s9 }
0x176e   :  { %v917_v2 = vpop.permute.xlu2 %916 }
0x1797   :  { %v921_v3 = vpop.permute.xlu0 %920 }
0x1798   :  { %v923_v5 = vsel %vm230_vm8, %v917_v2, %v921_v3 }
0x1799   :  { %1060 = vmatmul.msk.f32.vlgmr.msrb.gmra.mxu0 %vm310_vm14, %v923_v5 }
0x1816   :  { %v944_v31 = vpop.f32.mrf.mxu0 }
0x1817   :  { %v945_v21 = vadd.f32 %v1375_v9, %v944_v31 }
0x1819   :  { %967 = vrot.lane.b32.xlu2 %v945_v21, %s1223_s1  ;;  %v1061_v33 = vmul.f32 -1.442695, %v945_v21 }
0x181b   :  { %1145 = vpow2.f32 %v1061_v33 }
0x1821   :  { %v1146_v34 = vpop.eup %1145 }
0x1822   :  { %v950_v35 = vadd.f32 1.0, %v1146_v34 }
0x1824   :  { %1147 = vrcp.f32 %v950_v35  ;;  %v962_v42 = vand.u32 2147483648, %v950_v35  ;;  %vm956_vm8 = vweird.f32 %v950_v35  ;;  %v960_v43 = vand.u32 2147483647, %v950_v35 }
0x1826   :  { %v963_v47 = vor.u32 1.1754944e-38, %v962_v42  ;;  %vm961_vm11 = vcmp.eq.f32.partialorder %v960_v43, 8.507059e+37 }
0x182a   :  { %v1148_v36 = vpop.eup %1147 }
0x182b   :  { %v952_v1 = vmul.f32 %v1148_v36, %v950_v35  ;;  %vm957_vm10 = vweird.f32 %v1148_v36 }
0x182c   :  { %vm958_vm14 = vmor %vm956_vm8, %vm957_vm10 }
0x182d   :  { %v953_v37 = vsub.f32 1.0, %v952_v1 }
0x182f   :  { %v954_v38 = vmul.f32 %v1148_v36, %v953_v37 }
0x1831   :  { %v955_v41 = vadd.f32 %v1148_v36, %v954_v38 }
0x1833   :  { %v959_v45 = vsel %vm958_vm14, %v1148_v36, %v955_v41 }
0x1834   :  { %v964_v48 = vsel %vm961_vm11, %v963_v47, %v959_v45 }
0x1873   :  { %v968_v9 = vpop.permute.xlu2 %967 }
0x1874   :  { %v970_v50 = vmul.f32 %v968_v9, %v964_v48 }
0x1876   :  { %972 = vrot.lane.b32.xlu1 %v970_v50, %s1224_s7 }
0x18e8   :  { %v973_v40 = vpop.permute.xlu1 %972 }
0x18e9   :  { %v975_v51 = vadd.f32 %v973_v40, %v945_v21 }
0x18eb   :  { %1149 = vtanh.f32 %v975_v51 }
0x18f1   :  { %v1150_v52 = vpop.eup %1149 }
0x18f2   :  { %v977_v53 = vsub.f32 %v850_v29, %v1150_v52 }
0x18f4   :  { %979 = vrot.lane.b32.xlu0 %v977_v53, %s1225_s9 }
0x1966   :  { %v980_v54 = vpop.permute.xlu0 %979 }
0x1967   :  { %v982_v55 = vmul.f32 %v980_v54, %v964_v48 }
0x1969   :  { %984 = vrot.lane.b32.xlu2 %v982_v55, %s1223_s1 }
0x19c3   :  { %v985_v56 = vpop.permute.xlu2 %984 }
0x19c4   :  { %v987_v57 = vadd.f32 %v1150_v52, %v985_v56 }
0x19c6   :  { %v988_v58 = vmul.f32 %v987_v57, %v1385_v39 }
0x19c8   :  { %990 = vrot.lane.b32.xlu1 %v988_v58, %s1224_s7 }
0x1a3a   :  { %v991_v59 = vpop.permute.xlu1 %990 }
0x1a3b   :  { %v993_v6 = vsel %vm389_vm3, %v991_v59, 0.0  ;;  %vm1008_vm3 = vcmask 35872  }
0x1a3c   :  { %994 = vadd.xlane.f32.xlu0 %v993_v6 }
0x1aaf   :  { %v995_v7 = vpop.xlane.xlu0 %994 }
0x1ab0   :  { %v996_v8 = vadd.f32 %v995_v7, %v1393_v44 }
0x1ab2   :  { %1151 = vtanh.f32 %v996_v8 }
0x1ab8   :  { %v1152_v10 = vpop.eup %1151 }
0x1ab9   :  { %v1002_v11 = vmul.f32 %v1152_v10, %v1001_v46  ;;  %999 = vst.msk [vmem:[#allocation7] sm:$0xf] %vm998_vm12, %v1152_v10 }
0x1abb   :  { %v1003_v12 = vadd.f32 %v1002_v11, %v1473_v18 }
0x1abd   :  { %1005 = vrot.lane.b32.xlu2 %v1003_v12, %s1226_s16 }
0x1b17   :  { %v1006_v39 = vpop.permute.xlu2 %1005 }
0x1b18   :  { %1009 = vst.msk [vmem:[#allocation7] sm:$0xf] %vm1008_vm3, %v1006_v39 }
0x1b19   :  { %1020 = dma.vmem_to_hbm [thread:$0]  %s1016_s18, 64, %s1018_s21, [#allocation4]  }
0x1b1a   :  { %1217 = dma.done.wait [#allocation4], 64  }
0x1b1b   :  { %1218 = vsyncadd [#allocation4], 4294967232 }
0x1b1c   :  { %1025 = vsyncpa [#allocation3], 1 }
0x1b1d   :  { %1026 = vsyncpa [#allocation4], 1 }
0x1b1e   :  { %1027 = vsyncpa [#allocation5], 1 }

</bundles_post_ra>
